<compile_context>
chip_gen: v7x
topology: tpu7x:2x2x1
jax: 0.10.0
libtpu: 0.0.40
codegen_flags: <defaults>
</compile_context>

<pallas_src>
import functools

import jax
import jax.numpy as jnp
from jax import lax
from jax.experimental import pallas as pl
from jax.experimental.pallas import tpu as pltpu


def _conv_kernel(hcoef_ref, vcoef_ref, x_ref, out_ref, xpad_ref,
                 *, H, W, w, cb, ng):
    """Separable grouped Gaussian conv for one (sample, channel-block).

    hcoef_ref: (CG, w) f32 in SMEM  -- exp(-x^2 s^2 / 2) per output channel (lane taps)
    vcoef_ref: (CG, w) f32 in SMEM  -- |s| * exp(-y^2 s^2 / 2) per output channel (sublane taps)
    x_ref:     (1, cb, H, W)   input channel block
    out_ref:   (1, cb*ng, H, W) output channel block
    xpad_ref:  (cb, H+w-1, W+w-1) VMEM halo scratch (zero border = "same" padding)
    """
    p = w // 2
    j = pl.program_id(1)                       # channel-block index -> global channel offset

    # Zero halo buffer, then copy the unpadded tile into its interior (in-kernel padding).
    xpad_ref[...] = jnp.zeros_like(xpad_ref)
    for c in range(cb):                        # unrolled; cb is small
        xpad_ref[c, p:p + H, p:p + W] = x_ref[0, c]

    for c in range(cb):
        xp = xpad_ref[c]                       # (Hp, Wp) padded plane
        for g in range(ng):
            o = c * ng + g                     # output channel within this block
            oc = j * (cb * ng) + o             # global output channel -> coefficient row

            # Horizontal pass: tmp[y', x] = sum_dx hcoef[dx] * xp[y', x+dx]   -> (Hp, W)
            tmp = hcoef_ref[oc, 0] * xp[:, 0:W]
            for dx in range(1, w):
                tmp = tmp + hcoef_ref[oc, dx] * xp[:, dx:dx + W]

            # Vertical pass: out[y, x] = sum_dy vcoef[dy] * tmp[y+dy, x]      -> (H, W)
            acc = vcoef_ref[oc, 0] * tmp[0:H, :]
            for dy in range(1, w):
                acc = acc + vcoef_ref[oc, dy] * tmp[dy:dy + H, :]

            out_ref[0, o, :, :] = acc.astype(out_ref.dtype)


def gaussian2d_isotropic_forward(x, s, *, w, n_gaussian=1, channel_block=None):
    """x: (N, C, H, W) f32, s: (C*n_gaussian,) f32. Returns (out, filters[CG, w, w])."""
    N, C, H, W = x.shape
    G = n_gaussian
    CG = C * G
    assert s.shape == (CG,)
    assert w % 2 == 1, "'w' must be odd 3,5,7,9,11 etc."
    p = w // 2
    Hp, Wp = H + 2 * p, W + 2 * p

    Cb = C if channel_block is None else channel_block
    assert C % Cb == 0

    # Separable 1-D coefficient tables (tiny: CG*w floats each). Plain jnp glue.
    vals = jnp.arange(-p, p + 1, dtype=jnp.float32)                    # (w,)
    s_abs = jnp.abs(s.astype(jnp.float32))                             # (CG,)
    e = jnp.exp(-0.5 * (vals[None, :] ** 2) * (s_abs[:, None] ** 2))   # (CG, w)
    hcoef = e                                                          # lane-direction taps
    vcoef = s_abs[:, None] * e                                         # sublane taps (carries |s|)
    filters = vcoef[:, :, None] * hcoef[:, None, :]                    # (CG, w, w) exact 2-D filter

    kernel = functools.partial(_conv_kernel, H=H, W=W, w=w, cb=Cb, ng=G)

    out = pl.pallas_call(
        kernel,
        out_shape=jax.ShapeDtypeStruct((N, CG, H, W), x.dtype),
        grid_spec=pltpu.PrefetchScalarGridSpec(
            num_scalar_prefetch=2,                       # hcoef, vcoef -> SMEM, prefetched once
            grid=(N, C // Cb),
            in_specs=[
                pl.BlockSpec((1, Cb, H, W), lambda n, j, hc, vc: (n, j, 0, 0)),
            ],
            out_specs=pl.BlockSpec((1, Cb * G, H, W), lambda n, j, hc, vc: (n, j, 0, 0)),
            scratch_shapes=[pltpu.VMEM((Cb, Hp, Wp), jnp.float32)],
        ),
        compiler_params=pltpu.CompilerParams(
            dimension_semantics=("parallel", "parallel")),
    )(hcoef, vcoef, x)
    return out, filters


if __name__ == "__main__":
    key = jax.random.PRNGKey(0)
    kx, ks = jax.random.split(key)

    # Small shapes consistent with the module: w=5, in_channels=4, n_gaussian=1
    N, C, H, W = 2, 4, 16, 16
    w = 5
    n_gaussian = 1

    x = jax.random.normal(kx, (N, C, H, W), dtype=jnp.float32)
    # Deterministic stand-in for Parameter(torch.randn(in_channels * n_gaussian))
    s = jax.random.normal(ks, (C * n_gaussian,), dtype=jnp.float32)

    out, filters = gaussian2d_isotropic_forward(x, s, w=w, n_gaussian=n_gaussian)
    out = jax.block_until_ready(out)

    # Reference: grouped cross-correlation (== F.conv2d with groups=C) via lax.
    filt4d = filters.reshape(C * n_gaussian, 1, w, w)
    p = w // 2
    ref = lax.conv_general_dilated(
        x, filt4d, window_strides=(1, 1), padding=[(p, p), (p, p)],
        dimension_numbers=("NCHW", "OIHW", "NCHW"),
        feature_group_count=C)

    assert out.shape == (N, C * n_gaussian, H, W)
    assert out.dtype == x.dtype
    assert jnp.allclose(out, ref, atol=1e-5, rtol=1e-5)
    print("KERNEL_OK")
</pallas_src>

<mosaic_0001>
module attributes {stable_mosaic.version = 11 : i64} {
  func.func @_conv_kernel(%arg0: i32, %arg1: i32, %arg2: memref<4x5xf32, #tpu.memory_space<smem>>, %arg3: memref<4x5xf32, #tpu.memory_space<smem>>, %arg4: memref<1x4x16x16xf32, #tpu.memory_space<vmem>>, %arg5: memref<1x4x16x16xf32, #tpu.memory_space<vmem>>, %arg6: memref<4x20x20xf32, #tpu.memory_space<vmem>>) attributes {dimension_semantics = [#tpu.dimension_semantics<parallel>, #tpu.dimension_semantics<parallel>], iteration_bounds = array<i64: 2, 1>, scalar_prefetch = 2 : i64, scratch_operands = 1 : i64, tpu.core_type = #tpu.core_type<tc>, window_params = [{transform_indices = @transform_0, window_bounds = array<i64: 1, 4, 16, 16>}, {transform_indices = @transform_1, window_bounds = array<i64: 1, 4, 16, 16>}]} {
    %cst = arith.constant 0.000000e+00 : f32
    %0 = vector.broadcast %cst : f32 to vector<4x20x20xf32>
    %c0 = arith.constant 0 : index
    %c0_0 = arith.constant 0 : index
    %c0_1 = arith.constant 0 : index
    %1 = vector.load %arg6[%c0, %c0_0, %c0_1] : memref<4x20x20xf32, #tpu.memory_space<vmem>>, vector<4x20x20xf32>
    tpu.vector_store %arg6[%c0, %c0_0, %c0_1], %0 {strides = array<i32>} : memref<4x20x20xf32, #tpu.memory_space<vmem>>, vector<4x20x20xf32>,
    %c0_2 = arith.constant 0 : index
    %c0_3 = arith.constant 0 : index
    %c0_4 = arith.constant 0 : index
    %c0_5 = arith.constant 0 : index
    %2 = vector.load %arg4[%c0_2, %c0_3, %c0_4, %c0_5] : memref<1x4x16x16xf32, #tpu.memory_space<vmem>>, vector<1x1x16x16xf32>
    %3 = vector.shape_cast %2 : vector<1x1x16x16xf32> to vector<16x16xf32>
    %c0_6 = arith.constant 0 : index
    %c2 = arith.constant 2 : index
    %c2_7 = arith.constant 2 : index
    %4 = vector.load %arg6[%c0_6, %c2, %c2_7] : memref<4x20x20xf32, #tpu.memory_space<vmem>>, vector<1x16x16xf32>
    %5 = vector.shape_cast %4 : vector<1x16x16xf32> to vector<16x16xf32>
    %6 = vector.shape_cast %3 : vector<16x16xf32> to vector<1x16x16xf32>
    tpu.vector_store %arg6[%c0_6, %c2, %c2_7], %6 {strides = array<i32>} : memref<4x20x20xf32, #tpu.memory_space<vmem>>, vector<1x16x16xf32>,
    %c0_8 = arith.constant 0 : index
    %c1 = arith.constant 1 : index
    %c0_9 = arith.constant 0 : index
    %c0_10 = arith.constant 0 : index
    %7 = vector.load %arg4[%c0_8, %c1, %c0_9, %c0_10] : memref<1x4x16x16xf32, #tpu.memory_space<vmem>>, vector<1x1x16x16xf32>
    %8 = vector.shape_cast %7 : vector<1x1x16x16xf32> to vector<16x16xf32>
    %c1_11 = arith.constant 1 : index
    %c2_12 = arith.constant 2 : index
    %c2_13 = arith.constant 2 : index
    %9 = vector.load %arg6[%c1_11, %c2_12, %c2_13] : memref<4x20x20xf32, #tpu.memory_space<vmem>>, vector<1x16x16xf32>
    %10 = vector.shape_cast %9 : vector<1x16x16xf32> to vector<16x16xf32>
    %11 = vector.shape_cast %8 : vector<16x16xf32> to vector<1x16x16xf32>
    tpu.vector_store %arg6[%c1_11, %c2_12, %c2_13], %11 {strides = array<i32>} : memref<4x20x20xf32, #tpu.memory_space<vmem>>, vector<1x16x16xf32>,
    %c0_14 = arith.constant 0 : index
    %c2_15 = arith.constant 2 : index
    %c0_16 = arith.constant 0 : index
    %c0_17 = arith.constant 0 : index
    %12 = vector.load %arg4[%c0_14, %c2_15, %c0_16, %c0_17] : memref<1x4x16x16xf32, #tpu.memory_space<vmem>>, vector<1x1x16x16xf32>
    %13 = vector.shape_cast %12 : vector<1x1x16x16xf32> to vector<16x16xf32>
    %c2_18 = arith.constant 2 : index
    %c2_19 = arith.constant 2 : index
    %c2_20 = arith.constant 2 : index
    %14 = vector.load %arg6[%c2_18, %c2_19, %c2_20] : memref<4x20x20xf32, #tpu.memory_space<vmem>>, vector<1x16x16xf32>
    %15 = vector.shape_cast %14 : vector<1x16x16xf32> to vector<16x16xf32>
    %16 = vector.shape_cast %13 : vector<16x16xf32> to vector<1x16x16xf32>
    tpu.vector_store %arg6[%c2_18, %c2_19, %c2_20], %16 {strides = array<i32>} : memref<4x20x20xf32, #tpu.memory_space<vmem>>, vector<1x16x16xf32>,
    %c0_21 = arith.constant 0 : index
    %c3 = arith.constant 3 : index
    %c0_22 = arith.constant 0 : index
    %c0_23 = arith.constant 0 : index
    %17 = vector.load %arg4[%c0_21, %c3, %c0_22, %c0_23] : memref<1x4x16x16xf32, #tpu.memory_space<vmem>>, vector<1x1x16x16xf32>
    %18 = vector.shape_cast %17 : vector<1x1x16x16xf32> to vector<16x16xf32>
    %c3_24 = arith.constant 3 : index
    %c2_25 = arith.constant 2 : index
    %c2_26 = arith.constant 2 : index
    %19 = vector.load %arg6[%c3_24, %c2_25, %c2_26] : memref<4x20x20xf32, #tpu.memory_space<vmem>>, vector<1x16x16xf32>
    %20 = vector.shape_cast %19 : vector<1x16x16xf32> to vector<16x16xf32>
    %21 = vector.shape_cast %18 : vector<16x16xf32> to vector<1x16x16xf32>
    tpu.vector_store %arg6[%c3_24, %c2_25, %c2_26], %21 {strides = array<i32>} : memref<4x20x20xf32, #tpu.memory_space<vmem>>, vector<1x16x16xf32>,
    %c0_27 = arith.constant 0 : index
    %c0_28 = arith.constant 0 : index
    %c0_29 = arith.constant 0 : index
    %22 = vector.load %arg6[%c0_27, %c0_28, %c0_29] : memref<4x20x20xf32, #tpu.memory_space<vmem>>, vector<1x20x20xf32>
    %23 = vector.shape_cast %22 : vector<1x20x20xf32> to vector<20x20xf32>
    %c4_i32 = arith.constant 4 : i32
    %24 = arith.muli %arg1, %c4_i32 : i32
    %c0_i32 = arith.constant 0 : i32
    %25 = arith.addi %24, %c0_i32 : i32
    %26 = arith.index_cast %25 : i32 to index
    %c0_30 = arith.constant 0 : index
    %27 = memref.load %arg2[%26, %c0_30] : memref<4x5xf32, #tpu.memory_space<smem>>
    %28 = vector.extract_strided_slice %23 {offsets = [0, 0], sizes = [20, 16], strides = [1, 1]} : vector<20x20xf32> to vector<20x16xf32>
    %29 = vector.broadcast %27 : f32 to vector<20x16xf32>
    %30 = arith.mulf %29, %28 : vector<20x16xf32>
    %31 = arith.index_cast %25 : i32 to index
    %c1_31 = arith.constant 1 : index
    %32 = memref.load %arg2[%31, %c1_31] : memref<4x5xf32, #tpu.memory_space<smem>>
    %33 = vector.extract_strided_slice %23 {offsets = [0, 1], sizes = [20, 16], strides = [1, 1]} : vector<20x20xf32> to vector<20x16xf32>
    %34 = vector.broadcast %32 : f32 to vector<20x16xf32>
    %35 = arith.mulf %34, %33 : vector<20x16xf32>
    %36 = arith.addf %30, %35 : vector<20x16xf32>
    %37 = arith.index_cast %25 : i32 to index
    %c2_32 = arith.constant 2 : index
    %38 = memref.load %arg2[%37, %c2_32] : memref<4x5xf32, #tpu.memory_space<smem>>
    %39 = vector.extract_strided_slice %23 {offsets = [0, 2], sizes = [20, 16], strides = [1, 1]} : vector<20x20xf32> to vector<20x16xf32>
    %40 = vector.broadcast %38 : f32 to vector<20x16xf32>
    %41 = arith.mulf %40, %39 : vector<20x16xf32>
    %42 = arith.addf %36, %41 : vector<20x16xf32>
    %43 = arith.index_cast %25 : i32 to index
    %c3_33 = arith.constant 3 : index
    %44 = memref.load %arg2[%43, %c3_33] : memref<4x5xf32, #tpu.memory_space<smem>>
    %45 = vector.extract_strided_slice %23 {offsets = [0, 3], sizes = [20, 16], strides = [1, 1]} : vector<20x20xf32> to vector<20x16xf32>
    %46 = vector.broadcast %44 : f32 to vector<20x16xf32>
    %47 = arith.mulf %46, %45 : vector<20x16xf32>
    %48 = arith.addf %42, %47 : vector<20x16xf32>
    %49 = arith.index_cast %25 : i32 to index
    %c4 = arith.constant 4 : index
    %50 = memref.load %arg2[%49, %c4] : memref<4x5xf32, #tpu.memory_space<smem>>
    %51 = vector.extract_strided_slice %23 {offsets = [0, 4], sizes = [20, 16], strides = [1, 1]} : vector<20x20xf32> to vector<20x16xf32>
    %52 = vector.broadcast %50 : f32 to vector<20x16xf32>
    %53 = arith.mulf %52, %51 : vector<20x16xf32>
    %54 = arith.addf %48, %53 : vector<20x16xf32>
    %55 = arith.index_cast %25 : i32 to index
    %c0_34 = arith.constant 0 : index
    %56 = memref.load %arg3[%55, %c0_34] : memref<4x5xf32, #tpu.memory_space<smem>>
    %57 = vector.extract_strided_slice %54 {offsets = [0, 0], sizes = [16, 16], strides = [1, 1]} : vector<20x16xf32> to vector<16x16xf32>
    %58 = vector.broadcast %56 : f32 to vector<16x16xf32>
    %59 = arith.mulf %58, %57 : vector<16x16xf32>
    %60 = arith.index_cast %25 : i32 to index
    %c1_35 = arith.constant 1 : index
    %61 = memref.load %arg3[%60, %c1_35] : memref<4x5xf32, #tpu.memory_space<smem>>
    %62 = vector.extract_strided_slice %54 {offsets = [1, 0], sizes = [16, 16], strides = [1, 1]} : vector<20x16xf32> to vector<16x16xf32>
    %63 = vector.broadcast %61 : f32 to vector<16x16xf32>
    %64 = arith.mulf %63, %62 : vector<16x16xf32>
    %65 = arith.addf %59, %64 : vector<16x16xf32>
    %66 = arith.index_cast %25 : i32 to index
    %c2_36 = arith.constant 2 : index
    %67 = memref.load %arg3[%66, %c2_36] : memref<4x5xf32, #tpu.memory_space<smem>>
    %68 = vector.extract_strided_slice %54 {offsets = [2, 0], sizes = [16, 16], strides = [1, 1]} : vector<20x16xf32> to vector<16x16xf32>
    %69 = vector.broadcast %67 : f32 to vector<16x16xf32>
    %70 = arith.mulf %69, %68 : vector<16x16xf32>
    %71 = arith.addf %65, %70 : vector<16x16xf32>
    %72 = arith.index_cast %25 : i32 to index
    %c3_37 = arith.constant 3 : index
    %73 = memref.load %arg3[%72, %c3_37] : memref<4x5xf32, #tpu.memory_space<smem>>
    %74 = vector.extract_strided_slice %54 {offsets = [3, 0], sizes = [16, 16], strides = [1, 1]} : vector<20x16xf32> to vector<16x16xf32>
    %75 = vector.broadcast %73 : f32 to vector<16x16xf32>
    %76 = arith.mulf %75, %74 : vector<16x16xf32>
    %77 = arith.addf %71, %76 : vector<16x16xf32>
    %78 = arith.index_cast %25 : i32 to index
    %c4_38 = arith.constant 4 : index
    %79 = memref.load %arg3[%78, %c4_38] : memref<4x5xf32, #tpu.memory_space<smem>>
    %80 = vector.extract_strided_slice %54 {offsets = [4, 0], sizes = [16, 16], strides = [1, 1]} : vector<20x16xf32> to vector<16x16xf32>
    %81 = vector.broadcast %79 : f32 to vector<16x16xf32>
    %82 = arith.mulf %81, %80 : vector<16x16xf32>
    %83 = arith.addf %77, %82 : vector<16x16xf32>
    %c0_39 = arith.constant 0 : index
    %c0_40 = arith.constant 0 : index
    %c0_41 = arith.constant 0 : index
    %c0_42 = arith.constant 0 : index
    %84 = vector.load %arg5[%c0_39, %c0_40, %c0_41, %c0_42] : memref<1x4x16x16xf32, #tpu.memory_space<vmem>>, vector<1x1x16x16xf32>
    %85 = vector.shape_cast %84 : vector<1x1x16x16xf32> to vector<16x16xf32>
    %86 = vector.shape_cast %83 : vector<16x16xf32> to vector<1x1x16x16xf32>
    tpu.vector_store %arg5[%c0_39, %c0_40, %c0_41, %c0_42], %86 {strides = array<i32>} : memref<1x4x16x16xf32, #tpu.memory_space<vmem>>, vector<1x1x16x16xf32>,
    %c1_43 = arith.constant 1 : index
    %c0_44 = arith.constant 0 : index
    %c0_45 = arith.constant 0 : index
    %87 = vector.load %arg6[%c1_43, %c0_44, %c0_45] : memref<4x20x20xf32, #tpu.memory_space<vmem>>, vector<1x20x20xf32>
    %88 = vector.shape_cast %87 : vector<1x20x20xf32> to vector<20x20xf32>
    %c4_i32_46 = arith.constant 4 : i32
    %89 = arith.muli %arg1, %c4_i32_46 : i32
    %c1_i32 = arith.constant 1 : i32
    %90 = arith.addi %89, %c1_i32 : i32
    %91 = arith.index_cast %90 : i32 to index
    %c0_47 = arith.constant 0 : index
    %92 = memref.load %arg2[%91, %c0_47] : memref<4x5xf32, #tpu.memory_space<smem>>
    %93 = vector.extract_strided_slice %88 {offsets = [0, 0], sizes = [20, 16], strides = [1, 1]} : vector<20x20xf32> to vector<20x16xf32>
    %94 = vector.broadcast %92 : f32 to vector<20x16xf32>
    %95 = arith.mulf %94, %93 : vector<20x16xf32>
    %96 = arith.index_cast %90 : i32 to index
    %c1_48 = arith.constant 1 : index
    %97 = memref.load %arg2[%96, %c1_48] : memref<4x5xf32, #tpu.memory_space<smem>>
    %98 = vector.extract_strided_slice %88 {offsets = [0, 1], sizes = [20, 16], strides = [1, 1]} : vector<20x20xf32> to vector<20x16xf32>
    %99 = vector.broadcast %97 : f32 to vector<20x16xf32>
    %100 = arith.mulf %99, %98 : vector<20x16xf32>
    %101 = arith.addf %95, %100 : vector<20x16xf32>
    %102 = arith.index_cast %90 : i32 to index
    %c2_49 = arith.constant 2 : index
    %103 = memref.load %arg2[%102, %c2_49] : memref<4x5xf32, #tpu.memory_space<smem>>
    %104 = vector.extract_strided_slice %88 {offsets = [0, 2], sizes = [20, 16], strides = [1, 1]} : vector<20x20xf32> to vector<20x16xf32>
    %105 = vector.broadcast %103 : f32 to vector<20x16xf32>
    %106 = arith.mulf %105, %104 : vector<20x16xf32>
    %107 = arith.addf %101, %106 : vector<20x16xf32>
    %108 = arith.index_cast %90 : i32 to index
    %c3_50 = arith.constant 3 : index
    %109 = memref.load %arg2[%108, %c3_50] : memref<4x5xf32, #tpu.memory_space<smem>>
    %110 = vector.extract_strided_slice %88 {offsets = [0, 3], sizes = [20, 16], strides = [1, 1]} : vector<20x20xf32> to vector<20x16xf32>
    %111 = vector.broadcast %109 : f32 to vector<20x16xf32>
    %112 = arith.mulf %111, %110 : vector<20x16xf32>
    %113 = arith.addf %107, %112 : vector<20x16xf32>
    %114 = arith.index_cast %90 : i32 to index
    %c4_51 = arith.constant 4 : index
    %115 = memref.load %arg2[%114, %c4_51] : memref<4x5xf32, #tpu.memory_space<smem>>
    %116 = vector.extract_strided_slice %88 {offsets = [0, 4], sizes = [20, 16], strides = [1, 1]} : vector<20x20xf32> to vector<20x16xf32>
    %117 = vector.broadcast %115 : f32 to vector<20x16xf32>
    %118 = arith.mulf %117, %116 : vector<20x16xf32>
    %119 = arith.addf %113, %118 : vector<20x16xf32>
    %120 = arith.index_cast %90 : i32 to index
    %c0_52 = arith.constant 0 : index
    %121 = memref.load %arg3[%120, %c0_52] : memref<4x5xf32, #tpu.memory_space<smem>>
    %122 = vector.extract_strided_slice %119 {offsets = [0, 0], sizes = [16, 16], strides = [1, 1]} : vector<20x16xf32> to vector<16x16xf32>
    %123 = vector.broadcast %121 : f32 to vector<16x16xf32>
    %124 = arith.mulf %123, %122 : vector<16x16xf32>
    %125 = arith.index_cast %90 : i32 to index
    %c1_53 = arith.constant 1 : index
    %126 = memref.load %arg3[%125, %c1_53] : memref<4x5xf32, #tpu.memory_space<smem>>
    %127 = vector.extract_strided_slice %119 {offsets = [1, 0], sizes = [16, 16], strides = [1, 1]} : vector<20x16xf32> to vector<16x16xf32>
    %128 = vector.broadcast %126 : f32 to vector<16x16xf32>
    %129 = arith.mulf %128, %127 : vector<16x16xf32>
    %130 = arith.addf %124, %129 : vector<16x16xf32>
    %131 = arith.index_cast %90 : i32 to index
    %c2_54 = arith.constant 2 : index
    %132 = memref.load %arg3[%131, %c2_54] : memref<4x5xf32, #tpu.memory_space<smem>>
    %133 = vector.extract_strided_slice %119 {offsets = [2, 0], sizes = [16, 16], strides = [1, 1]} : vector<20x16xf32> to vector<16x16xf32>
    %134 = vector.broadcast %132 : f32 to vector<16x16xf32>
    %135 = arith.mulf %134, %133 : vector<16x16xf32>
    %136 = arith.addf %130, %135 : vector<16x16xf32>
    %137 = arith.index_cast %90 : i32 to index
    %c3_55 = arith.constant 3 : index
    %138 = memref.load %arg3[%137, %c3_55] : memref<4x5xf32, #tpu.memory_space<smem>>
    %139 = vector.extract_strided_slice %119 {offsets = [3, 0], sizes = [16, 16], strides = [1, 1]} : vector<20x16xf32> to vector<16x16xf32>
    %140 = vector.broadcast %138 : f32 to vector<16x16xf32>
    %141 = arith.mulf %140, %139 : vector<16x16xf32>
    %142 = arith.addf %136, %141 : vector<16x16xf32>
    %143 = arith.index_cast %90 : i32 to index
    %c4_56 = arith.constant 4 : index
    %144 = memref.load %arg3[%143, %c4_56] : memref<4x5xf32, #tpu.memory_space<smem>>
    %145 = vector.extract_strided_slice %119 {offsets = [4, 0], sizes = [16, 16], strides = [1, 1]} : vector<20x16xf32> to vector<16x16xf32>
    %146 = vector.broadcast %144 : f32 to vector<16x16xf32>
    %147 = arith.mulf %146, %145 : vector<16x16xf32>
    %148 = arith.addf %142, %147 : vector<16x16xf32>
    %c0_57 = arith.constant 0 : index
    %c1_58 = arith.constant 1 : index
    %c0_59 = arith.constant 0 : index
    %c0_60 = arith.constant 0 : index
    %149 = vector.load %arg5[%c0_57, %c1_58, %c0_59, %c0_60] : memref<1x4x16x16xf32, #tpu.memory_space<vmem>>, vector<1x1x16x16xf32>
    %150 = vector.shape_cast %149 : vector<1x1x16x16xf32> to vector<16x16xf32>
    %151 = vector.shape_cast %148 : vector<16x16xf32> to vector<1x1x16x16xf32>
    tpu.vector_store %arg5[%c0_57, %c1_58, %c0_59, %c0_60], %151 {strides = array<i32>} : memref<1x4x16x16xf32, #tpu.memory_space<vmem>>, vector<1x1x16x16xf32>,
    %c2_61 = arith.constant 2 : index
    %c0_62 = arith.constant 0 : index
    %c0_63 = arith.constant 0 : index
    %152 = vector.load %arg6[%c2_61, %c0_62, %c0_63] : memref<4x20x20xf32, #tpu.memory_space<vmem>>, vector<1x20x20xf32>
    %153 = vector.shape_cast %152 : vector<1x20x20xf32> to vector<20x20xf32>
    %c4_i32_64 = arith.constant 4 : i32
    %154 = arith.muli %arg1, %c4_i32_64 : i32
    %c2_i32 = arith.constant 2 : i32
    %155 = arith.addi %154, %c2_i32 : i32
    %156 = arith.index_cast %155 : i32 to index
    %c0_65 = arith.constant 0 : index
    %157 = memref.load %arg2[%156, %c0_65] : memref<4x5xf32, #tpu.memory_space<smem>>
    %158 = vector.extract_strided_slice %153 {offsets = [0, 0], sizes = [20, 16], strides = [1, 1]} : vector<20x20xf32> to vector<20x16xf32>
    %159 = vector.broadcast %157 : f32 to vector<20x16xf32>
    %160 = arith.mulf %159, %158 : vector<20x16xf32>
    %161 = arith.index_cast %155 : i32 to index
    %c1_66 = arith.constant 1 : index
    %162 = memref.load %arg2[%161, %c1_66] : memref<4x5xf32, #tpu.memory_space<smem>>
    %163 = vector.extract_strided_slice %153 {offsets = [0, 1], sizes = [20, 16], strides = [1, 1]} : vector<20x20xf32> to vector<20x16xf32>
    %164 = vector.broadcast %162 : f32 to vector<20x16xf32>
    %165 = arith.mulf %164, %163 : vector<20x16xf32>
    %166 = arith.addf %160, %165 : vector<20x16xf32>
    %167 = arith.index_cast %155 : i32 to index
    %c2_67 = arith.constant 2 : index
    %168 = memref.load %arg2[%167, %c2_67] : memref<4x5xf32, #tpu.memory_space<smem>>
    %169 = vector.extract_strided_slice %153 {offsets = [0, 2], sizes = [20, 16], strides = [1, 1]} : vector<20x20xf32> to vector<20x16xf32>
    %170 = vector.broadcast %168 : f32 to vector<20x16xf32>
    %171 = arith.mulf %170, %169 : vector<20x16xf32>
    %172 = arith.addf %166, %171 : vector<20x16xf32>
    %173 = arith.index_cast %155 : i32 to index
    %c3_68 = arith.constant 3 : index
    %174 = memref.load %arg2[%173, %c3_68] : memref<4x5xf32, #tpu.memory_space<smem>>
    %175 = vector.extract_strided_slice %153 {offsets = [0, 3], sizes = [20, 16], strides = [1, 1]} : vector<20x20xf32> to vector<20x16xf32>
    %176 = vector.broadcast %174 : f32 to vector<20x16xf32>
    %177 = arith.mulf %176, %175 : vector<20x16xf32>
    %178 = arith.addf %172, %177 : vector<20x16xf32>
    %179 = arith.index_cast %155 : i32 to index
    %c4_69 = arith.constant 4 : index
    %180 = memref.load %arg2[%179, %c4_69] : memref<4x5xf32, #tpu.memory_space<smem>>
    %181 = vector.extract_strided_slice %153 {offsets = [0, 4], sizes = [20, 16], strides = [1, 1]} : vector<20x20xf32> to vector<20x16xf32>
    %182 = vector.broadcast %180 : f32 to vector<20x16xf32>
    %183 = arith.mulf %182, %181 : vector<20x16xf32>
    %184 = arith.addf %178, %183 : vector<20x16xf32>
    %185 = arith.index_cast %155 : i32 to index
    %c0_70 = arith.constant 0 : index
    %186 = memref.load %arg3[%185, %c0_70] : memref<4x5xf32, #tpu.memory_space<smem>>
    %187 = vector.extract_strided_slice %184 {offsets = [0, 0], sizes = [16, 16], strides = [1, 1]} : vector<20x16xf32> to vector<16x16xf32>
    %188 = vector.broadcast %186 : f32 to vector<16x16xf32>
    %189 = arith.mulf %188, %187 : vector<16x16xf32>
    %190 = arith.index_cast %155 : i32 to index
    %c1_71 = arith.constant 1 : index
    %191 = memref.load %arg3[%190, %c1_71] : memref<4x5xf32, #tpu.memory_space<smem>>
    %192 = vector.extract_strided_slice %184 {offsets = [1, 0], sizes = [16, 16], strides = [1, 1]} : vector<20x16xf32> to vector<16x16xf32>
    %193 = vector.broadcast %191 : f32 to vector<16x16xf32>
    %194 = arith.mulf %193, %192 : vector<16x16xf32>
    %195 = arith.addf %189, %194 : vector<16x16xf32>
    %196 = arith.index_cast %155 : i32 to index
    %c2_72 = arith.constant 2 : index
    %197 = memref.load %arg3[%196, %c2_72] : memref<4x5xf32, #tpu.memory_space<smem>>
    %198 = vector.extract_strided_slice %184 {offsets = [2, 0], sizes = [16, 16], strides = [1, 1]} : vector<20x16xf32> to vector<16x16xf32>
    %199 = vector.broadcast %197 : f32 to vector<16x16xf32>
    %200 = arith.mulf %199, %198 : vector<16x16xf32>
    %201 = arith.addf %195, %200 : vector<16x16xf32>
    %202 = arith.index_cast %155 : i32 to index
    %c3_73 = arith.constant 3 : index
    %203 = memref.load %arg3[%202, %c3_73] : memref<4x5xf32, #tpu.memory_space<smem>>
    %204 = vector.extract_strided_slice %184 {offsets = [3, 0], sizes = [16, 16], strides = [1, 1]} : vector<20x16xf32> to vector<16x16xf32>
    %205 = vector.broadcast %203 : f32 to vector<16x16xf32>
    %206 = arith.mulf %205, %204 : vector<16x16xf32>
    %207 = arith.addf %201, %206 : vector<16x16xf32>
    %208 = arith.index_cast %155 : i32 to index
    %c4_74 = arith.constant 4 : index
    %209 = memref.load %arg3[%208, %c4_74] : memref<4x5xf32, #tpu.memory_space<smem>>
    %210 = vector.extract_strided_slice %184 {offsets = [4, 0], sizes = [16, 16], strides = [1, 1]} : vector<20x16xf32> to vector<16x16xf32>
    %211 = vector.broadcast %209 : f32 to vector<16x16xf32>
    %212 = arith.mulf %211, %210 : vector<16x16xf32>
    %213 = arith.addf %207, %212 : vector<16x16xf32>
    %c0_75 = arith.constant 0 : index
    %c2_76 = arith.constant 2 : index
    %c0_77 = arith.constant 0 : index
    %c0_78 = arith.constant 0 : index
    %214 = vector.load %arg5[%c0_75, %c2_76, %c0_77, %c0_78] : memref<1x4x16x16xf32, #tpu.memory_space<vmem>>, vector<1x1x16x16xf32>
    %215 = vector.shape_cast %214 : vector<1x1x16x16xf32> to vector<16x16xf32>
    %216 = vector.shape_cast %213 : vector<16x16xf32> to vector<1x1x16x16xf32>
    tpu.vector_store %arg5[%c0_75, %c2_76, %c0_77, %c0_78], %216 {strides = array<i32>} : memref<1x4x16x16xf32, #tpu.memory_space<vmem>>, vector<1x1x16x16xf32>,
    %c3_79 = arith.constant 3 : index
    %c0_80 = arith.constant 0 : index
    %c0_81 = arith.constant 0 : index
    %217 = vector.load %arg6[%c3_79, %c0_80, %c0_81] : memref<4x20x20xf32, #tpu.memory_space<vmem>>, vector<1x20x20xf32>
    %218 = vector.shape_cast %217 : vector<1x20x20xf32> to vector<20x20xf32>
    %c4_i32_82 = arith.constant 4 : i32
    %219 = arith.muli %arg1, %c4_i32_82 : i32
    %c3_i32 = arith.constant 3 : i32
    %220 = arith.addi %219, %c3_i32 : i32
    %221 = arith.index_cast %220 : i32 to index
    %c0_83 = arith.constant 0 : index
    %222 = memref.load %arg2[%221, %c0_83] : memref<4x5xf32, #tpu.memory_space<smem>>
    %223 = vector.extract_strided_slice %218 {offsets = [0, 0], sizes = [20, 16], strides = [1, 1]} : vector<20x20xf32> to vector<20x16xf32>
    %224 = vector.broadcast %222 : f32 to vector<20x16xf32>
    %225 = arith.mulf %224, %223 : vector<20x16xf32>
    %226 = arith.index_cast %220 : i32 to index
    %c1_84 = arith.constant 1 : index
    %227 = memref.load %arg2[%226, %c1_84] : memref<4x5xf32, #tpu.memory_space<smem>>
    %228 = vector.extract_strided_slice %218 {offsets = [0, 1], sizes = [20, 16], strides = [1, 1]} : vector<20x20xf32> to vector<20x16xf32>
    %229 = vector.broadcast %227 : f32 to vector<20x16xf32>
    %230 = arith.mulf %229, %228 : vector<20x16xf32>
    %231 = arith.addf %225, %230 : vector<20x16xf32>
    %232 = arith.index_cast %220 : i32 to index
    %c2_85 = arith.constant 2 : index
    %233 = memref.load %arg2[%232, %c2_85] : memref<4x5xf32, #tpu.memory_space<smem>>
    %234 = vector.extract_strided_slice %218 {offsets = [0, 2], sizes = [20, 16], strides = [1, 1]} : vector<20x20xf32> to vector<20x16xf32>
    %235 = vector.broadcast %233 : f32 to vector<20x16xf32>
    %236 = arith.mulf %235, %234 : vector<20x16xf32>
    %237 = arith.addf %231, %236 : vector<20x16xf32>
    %238 = arith.index_cast %220 : i32 to index
    %c3_86 = arith.constant 3 : index
    %239 = memref.load %arg2[%238, %c3_86] : memref<4x5xf32, #tpu.memory_space<smem>>
    %240 = vector.extract_strided_slice %218 {offsets = [0, 3], sizes = [20, 16], strides = [1, 1]} : vector<20x20xf32> to vector<20x16xf32>
    %241 = vector.broadcast %239 : f32 to vector<20x16xf32>
    %242 = arith.mulf %241, %240 : vector<20x16xf32>
    %243 = arith.addf %237, %242 : vector<20x16xf32>
    %244 = arith.index_cast %220 : i32 to index
    %c4_87 = arith.constant 4 : index
    %245 = memref.load %arg2[%244, %c4_87] : memref<4x5xf32, #tpu.memory_space<smem>>
    %246 = vector.extract_strided_slice %218 {offsets = [0, 4], sizes = [20, 16], strides = [1, 1]} : vector<20x20xf32> to vector<20x16xf32>
    %247 = vector.broadcast %245 : f32 to vector<20x16xf32>
    %248 = arith.mulf %247, %246 : vector<20x16xf32>
    %249 = arith.addf %243, %248 : vector<20x16xf32>
    %250 = arith.index_cast %220 : i32 to index
    %c0_88 = arith.constant 0 : index
    %251 = memref.load %arg3[%250, %c0_88] : memref<4x5xf32, #tpu.memory_space<smem>>
    %252 = vector.extract_strided_slice %249 {offsets = [0, 0], sizes = [16, 16], strides = [1, 1]} : vector<20x16xf32> to vector<16x16xf32>
    %253 = vector.broadcast %251 : f32 to vector<16x16xf32>
    %254 = arith.mulf %253, %252 : vector<16x16xf32>
    %255 = arith.index_cast %220 : i32 to index
    %c1_89 = arith.constant 1 : index
    %256 = memref.load %arg3[%255, %c1_89] : memref<4x5xf32, #tpu.memory_space<smem>>
    %257 = vector.extract_strided_slice %249 {offsets = [1, 0], sizes = [16, 16], strides = [1, 1]} : vector<20x16xf32> to vector<16x16xf32>
    %258 = vector.broadcast %256 : f32 to vector<16x16xf32>
    %259 = arith.mulf %258, %257 : vector<16x16xf32>
    %260 = arith.addf %254, %259 : vector<16x16xf32>
    %261 = arith.index_cast %220 : i32 to index
    %c2_90 = arith.constant 2 : index
    %262 = memref.load %arg3[%261, %c2_90] : memref<4x5xf32, #tpu.memory_space<smem>>
    %263 = vector.extract_strided_slice %249 {offsets = [2, 0], sizes = [16, 16], strides = [1, 1]} : vector<20x16xf32> to vector<16x16xf32>
    %264 = vector.broadcast %262 : f32 to vector<16x16xf32>
    %265 = arith.mulf %264, %263 : vector<16x16xf32>
    %266 = arith.addf %260, %265 : vector<16x16xf32>
    %267 = arith.index_cast %220 : i32 to index
    %c3_91 = arith.constant 3 : index
    %268 = memref.load %arg3[%267, %c3_91] : memref<4x5xf32, #tpu.memory_space<smem>>
    %269 = vector.extract_strided_slice %249 {offsets = [3, 0], sizes = [16, 16], strides = [1, 1]} : vector<20x16xf32> to vector<16x16xf32>
    %270 = vector.broadcast %268 : f32 to vector<16x16xf32>
    %271 = arith.mulf %270, %269 : vector<16x16xf32>
    %272 = arith.addf %266, %271 : vector<16x16xf32>
    %273 = arith.index_cast %220 : i32 to index
    %c4_92 = arith.constant 4 : index
    %274 = memref.load %arg3[%273, %c4_92] : memref<4x5xf32, #tpu.memory_space<smem>>
    %275 = vector.extract_strided_slice %249 {offsets = [4, 0], sizes = [16, 16], strides = [1, 1]} : vector<20x16xf32> to vector<16x16xf32>
    %276 = vector.broadcast %274 : f32 to vector<16x16xf32>
    %277 = arith.mulf %276, %275 : vector<16x16xf32>
    %278 = arith.addf %272, %277 : vector<16x16xf32>
    %c0_93 = arith.constant 0 : index
    %c3_94 = arith.constant 3 : index
    %c0_95 = arith.constant 0 : index
    %c0_96 = arith.constant 0 : index
    %279 = vector.load %arg5[%c0_93, %c3_94, %c0_95, %c0_96] : memref<1x4x16x16xf32, #tpu.memory_space<vmem>>, vector<1x1x16x16xf32>
    %280 = vector.shape_cast %279 : vector<1x1x16x16xf32> to vector<16x16xf32>
    %281 = vector.shape_cast %278 : vector<16x16xf32> to vector<1x1x16x16xf32>
    tpu.vector_store %arg5[%c0_93, %c3_94, %c0_95, %c0_96], %281 {strides = array<i32>} : memref<1x4x16x16xf32, #tpu.memory_space<vmem>>, vector<1x1x16x16xf32>,
    return
  }
  func.func @transform_0(%arg0: i32, %arg1: i32, %arg2: memref<4x5xf32, #tpu.memory_space<smem>>, %arg3: memref<4x5xf32, #tpu.memory_space<smem>>) -> (i32, i32, i32, i32) {
    %c0_i32 = arith.constant 0 : i32
    %c0_i32_0 = arith.constant 0 : i32
    %c0_i32_1 = arith.constant 0 : i32
    return %arg0, %arg1, %c0_i32, %c0_i32_0 : i32, i32, i32, i32
  }
  func.func @transform_1(%arg0: i32, %arg1: i32, %arg2: memref<4x5xf32, #tpu.memory_space<smem>>, %arg3: memref<4x5xf32, #tpu.memory_space<smem>>) -> (i32, i32, i32, i32) {
    %c0_i32 = arith.constant 0 : i32
    %c0_i32_0 = arith.constant 0 : i32
    %c0_i32_1 = arith.constant 0 : i32
    return %arg0, %arg1, %c0_i32, %c0_i32_0 : i32, i32, i32, i32
  }
}

</mosaic_0001>

<bundles_post_ra>
// kernel: tpu_custom_call.1
= control target key start
LH: loop header
LB: loop body
LE: loop exit
PB: predicated region body
PF: predicated region fallthrough
CT: control target
= control target key end

     0   :  { %s1956_s0 = inlined_call_operand.hbm [shape: f32[4,5], index: 0, kind: input, shape index: {}]   ;;  %s1957_s2 = inlined_call_operand.hbm [shape: f32[2,4,16,16], index: 2, kind: input, shape index: {}]   ;;  %s1958_s3 = inlined_call_operand.hbm [shape: f32[2,4,16,16], index: 3, kind: output, shape index: {}]   ;;  %s1959_s1 = inlined_call_operand.hbm [shape: f32[4,5], index: 1, kind: input, shape index: {}]  }
   0x1   :  { %1964 = sst [smem:[#allocation15_spill]] %s1957_s2  ;;  %s1158_s14 = scalar_lea.hbm %s1956_s0, 64 }
   0x2   :  { %p1159_p0 = scmp.ne.s32.totalorder %s1956_s0, %s1158_s14  ;;  %p1162_p1 = scmp.lt.u32.totalorder %s1158_s14, %s1956_s0 }
   0x4   :  { %p1164_p2 = pnand %p1162_p1, %p1159_p0 }
   0x6   :  { %1167 = shalt.err (!%p1164_p2)  }
   0x7   :  { %s1294_s19 = smov [#allocation4]   ;;  %s1168_s24 = scalar_lea.hbm %s1959_s1, 64 }
   0x8   :  { %9 = dma.hbm_to_smem %s1956_s0, 64, %s1294_s19, [#allocation3] }
   0x9   :  { %p1169_p3 = scmp.ne.s32.totalorder %s1959_s1, %s1168_s24  ;;  %p1172_p4 = scmp.lt.u32.totalorder %s1168_s24, %s1959_s1 }
   0xb   :  { %p1174_p5 = pnand %p1172_p4, %p1169_p3 }
   0xd   :  { %1177 = shalt.err (!%p1174_p5)  }
   0xe   :  { %s1295_s29 = smov [#allocation5]  }
   0xf   :  { %11 = dma.hbm_to_smem %s1959_s1, 64, %s1295_s29, [#allocation3] }
  0x10   :  { %1260 = dma.done.wait [#allocation3], 128 }
  0x11   :  { %1261 = vsyncadd [#allocation3], 4294967168 }
  0x12   :  { %13 = sfence }
  0x13   :  { %14 = vsyncpa [#allocation7], 0 }
  0x14   :  { %16 = vsyncpa [#allocation7 + $0x1], 0 }
  0x15   :  { %17 = vsyncpa [#allocation8], 0 }
  0x16   :  { %19 = vsyncpa [#allocation8 + $0x1], 0  ;;  %s1352_s0 = smov 0   ;;  %s1354_s5 = smov 0  }
  0x17   :  { %s1356_s6 = smov 0   ;;  %s1358_s7 = smov 0  }
  0x18   :  { %s1360_s8 = smov 0   ;;  %s1362_s9 = smov 0  }
  0x19 LB: > { %1965 = sst [smem:[#allocation13_spill]] %s1288_s8  ;;  %s1017_s1 = sadd.s32 4294967295, %s1292_s9   ;;  %s1292_s9 = sphi %s1362_s9, %s25_s9   ;;  %s1288_s8 = sphi %s1360_s8, %s1979_s8   ;;  %s1284_s7 = sphi %s1358_s7, %s1978_s7   ;;  %s1280_s6 = sphi %s1356_s6, %s1982_s6   ;;  %s1276_s5 = sphi %s1354_s5, %s1981_s5   ;;  %s1272_s0 = sphi %s1352_s0, %s1980_s0  }
  0x1a   : > { %s1018_s10 = sadd.s32 4294967294, %s1292_s9   ;;  %s37_s11 = sadd.s32 1, %s1288_s8 }
  0x1b   : > { %s46_s12 = sadd.s32 1, %s1280_s6  ;;  %p39_p6 = scmp.ge.s32.totalorder %s37_s11, 2 }
  0x1c   : > { %p53_p7 = scmp.ne.s32.totalorder %s1280_s6, %s1276_s5  ;;  %p54_p8 = scmp.eq.s32.totalorder %s1292_s9, 0 }
  0x1d   : > { %p59_p9 = scmp.ne.s32.totalorder %s1276_s5, %s1272_s0  ;;  %s1984_s11 = smov (%p39_p6, %s37_s11), 0 }
  0x1e   : > { %1966 = sst [smem:[#allocation14_spill]] %s1984_s11  ;;  %p1393_p10 = por %p54_p8, %p53_p7 }
  0x1f   : > { %p60_p11 = scmp.eq.s32.totalorder %s1017_s1, 0  ;;  %s41_s14 = ssub.s32 %s1288_s8, %s1984_s11 }
  0x20   : > { %p85_p12 = scmp.eq.s32.totalorder %s1017_s1, 1  ;;  %p44_p13 = scmp.eq.s32.totalorder %s41_s14, 0 }
  0x21   : > { %p1399_p0 = por %p60_p11, %p59_p9  ;;  %p91_p2 = scmp.eq.s32.totalorder %s1018_s10, 1 }
  0x22   : > { %p1403_p1 = por %p85_p12, %p53_p7  ;;  %p1096_p5 = scmp.lt.s32.totalorder %s1292_s9, 2 }
  0x23   : > { %s1408_s17 = scalar_select %p44_p13, %s1280_s6, %s46_s12  }
  0x24   : > { %s1969_s16 = scalar_select %p1403_p1, 1, 0 }
  0x25   : > { %p1410_p3 = por %p91_p2, %p59_p9  ;;  %s111_s19 = sand.u32 1, %s1280_s6  }
  0x26   : > { %s1021_s20 = sshll.u32 %s111_s19, 6  ;;  %s1082_s21 = sshll.u32 %s1288_s8, 10 }
  0x27   : > { %s1970_s18 = scalar_select %p1410_p3, 1, 0 }
  0x28   : > { %s1971_s2 = sld [smem:[#allocation15_spill]]  ;;  %s115_s25 = scalar_lea.vmem [#allocation6], %s1021_s20 }
  0x29   : > { %s125_s26 = sshll.u32 %s115_s25, 4  ;;  %p1427_p6 = pnand %p1096_p5, %p1393_p10  ;;  %s1423_s26 = int_to_ptr.vmem [resolvable:$true] %s125_s26 }
  0x2a   : > { %s1432_s28 = scalar_lea.sflag [#allocation7], %s111_s19 }
  0x2b   : > { %p1180_p9 = pneg %p1427_p6 }
  0x2e   : > { %s1421_s24 = scalar_lea.hbm %s1971_s2, %s1082_s21  ;;  %s1183_s1 = scalar_lea.hbm %s1971_s2, 2048 }
  0x2f   : > { %s1178_s29 = scalar_lea.hbm %s1421_s24, 1024  ;;  %p1184_p10 = scmp.lt.u32.totalorder %s1421_s24, %s1971_s2 }
  0x30   : > { %p1179_p8 = scmp.ne.s32.totalorder %s1421_s24, %s1178_s29  ;;  %p1185_p13 = scmp.lt.u32.totalorder %s1183_s1, %s1178_s29 }
  0x31   : > { %p1187_p5 = scmp.lt.u32.totalorder %s1178_s29, %s1421_s24 }
  0x32   : > { %p1181_p11 = pnand %p1180_p9, %p1179_p8  ;;  %p1186_p2 = por %p1185_p13, %p1184_p10 }
  0x34   : > { %p1182_p12 = pneg %p1181_p11  ;;  %p1188_p4 = por %p1187_p5, %p1186_p2 }
  0x36   : > { %p1189_p7 = pnand %p1188_p4, %p1182_p12 }
  0x38   : > { %1192 = shalt.err (!%p1189_p7)
}
  0x39   : > { %s1193_s13 = scalar_lea.vmem %s1423_s26, 1024  ;;  %s1296_s14 = smov [#allocation6]  }
  0x3a   : > { %p1194_p8 = scmp.ne.s32.totalorder %s1423_s26, %s1193_s13  ;;  %s1198_s19 = sshll.u32 %s1296_s14, 4  ;;  %s1199_s19 = int_to_ptr.vmem [resolvable:$false] %s1198_s19 }
  0x3b   : > { %s1200_s20 = scalar_lea.vmem %s1199_s19, 2048  ;;  %p1201_p1 = scmp.lt.s32.totalorder %s1423_s26, %s1199_s19 }
  0x3c   : > { %p1196_p11 = pnand %p1194_p8, %p1180_p9  ;;  %p1202_p10 = scmp.lt.s32.totalorder %s1200_s20, %s1193_s13 }
  0x3e   : > { %p1197_p3 = pneg %p1196_p11  ;;  %p1203_p13 = por %p1202_p10, %p1201_p1 }
  0x40   : > { %p1204_p2 = pnand %p1203_p13, %p1197_p3 }
  0x42   : > { %1207 = shalt.err (!%p1204_p2)
}
  0x43   : > { %s1297_s21 = smov 128   ;;  %s1298_s22 = smov 8  }
  0x44   : > { %1091 = dma.hbm_to_vmem [thread:$0]  (!%p1427_p6), %s1421_s24, 1024, %s1423_s26, %s1432_s28, %s1297_s21, %s1297_s21, %s1298_s22  }
  0x45   : > { %p133_p4 = scmp.lt.s32.totalorder %s1292_s9, 3  ;;  %p1973_p7 = scmp.ge.s32.totalorder %s1292_s9, 1 }
  0x47   : > { %p134_p9 = pnand %p1973_p7, %p133_p4 }
  0x48   : > { %s1464_s23 = sand.u32 (!%p134_p9), 1, %s1276_s5  }
  0x49   : > { %137 = sbr.rel (%p134_p9) target bundleno = 461 (0x1cd), region = 24  ;;  %s1961_s25 = sshll.u32 (!%p134_p9), %s1464_s23, 6 }
  0x4a   : > { %s140_s29 = scalar_lea.sflag (!%p134_p9), [#allocation7], %s1464_s23  ;;  %s1470_s30 = scalar_lea.vmem (!%p134_p9), [#allocation6], %s1961_s25 }
  0x50   : > { %1263 = dma.done.wait (%p1399_p0), %s140_s29, 1024  }
  0x51   : > { %1265 = vsyncadd (%p1399_p0), %s140_s29, 4294966272  ;;  %vm164_vm0 = vcmask 162816   ;;  %vm167_vm1 = vcmask 158720   ;;  %v1299_v0 = vmov 0.0   ;;  %v178_v1 = vld [vmem:[%s1470_s30] sm:$0xff]  ;;  %v1027_v2 = vld [vmem:[%s1470_s30 + $0x10] sm:$0xff] }
  0x52   : > { %165 = vst.msk [vmem:[#allocation2] sm:$0xff] %vm164_vm0, %v1299_v0  ;;  %166 = vst.msk [vmem:[#allocation2 + $0x8] sm:$0xff] %vm164_vm0, %v1299_v0  ;;  %s1300_s15 = smov 2   ;;  %v179_v3 = vld [vmem:[%s1470_s30 + $0x8] sm:$0xff]  ;;  %v1028_v4 = vld [vmem:[%s1470_s30 + $0x18] sm:$0xff]  ;;  %vm188_vm2 = vcmask 146448  }
  0x53   : > { %169 = vst.msk [vmem:[#allocation2 + $0x18] sm:$0xff] %vm164_vm0, %v1299_v0  ;;  %170 = vst.msk [vmem:[#allocation2 + $0x20] sm:$0xff] %vm164_vm0, %v1299_v0  ;;  %182 = vrot.lane.b32.xlu0 %v178_v1, %s1300_s15  ;;  %196 = vrot.lane.b32.xlu1 %v1027_v2, %s1300_s15  ;;  %v1030_v5 = vld [vmem:[%s1470_s30 + $0x28] sm:$0xff]  ;;  %v1029_v6 = vld [vmem:[%s1470_s30 + $0x20] sm:$0xff]  ;;  %s1033_s24 = sld [smem:[#allocation4 + $0x1]]  ;;  %s1034_s26 = sld [smem:[#allocation4 + $0x2]] }
  0x54   : > { %172 = vst.msk [vmem:[#allocation2 + $0x30] sm:$0xff] %vm164_vm0, %v1299_v0  ;;  %173 = vst.msk [vmem:[#allocation2 + $0x38] sm:$0xff] %vm164_vm0, %v1299_v0  ;;  %v1031_v7 = vld [vmem:[%s1470_s30 + $0x30] sm:$0xff]  ;;  %v1032_v8 = vld [vmem:[%s1470_s30 + $0x38] sm:$0xff]  ;;  %s1035_s27 = sld [smem:[#allocation4 + $0x3]]  ;;  %s1301_s28 = smov 127  }
  0x55   : > { %175 = vst.msk [vmem:[#allocation2 + $0x48] sm:$0xff] %vm164_vm0, %v1299_v0  ;;  %176 = vst.msk [vmem:[#allocation2 + $0x50] sm:$0xff] %vm164_vm0, %v1299_v0  ;;  %s1042_s4 = sld [smem:[#allocation4 + $0x81]]  ;;  %s1302_s1 = smov 126   ;;  %vm339_vm3 = vcmask 1046528   ;;  %vm357_vm4 = vcmask 1045504  }
  0x56   : > { %168 = vst.msk [vmem:[#allocation2 + $0x10] sm:$0xf] %vm167_vm1, %v1299_v0  ;;  %171 = vst.msk [vmem:[#allocation2 + $0x28] sm:$0xf] %vm167_vm1, %v1299_v0  ;;  %s1054_s10 = sld [smem:[#allocation4 + $0x101]]  ;;  %s1303_s12 = smov 125  }
  0x57   : > { %174 = vst.msk [vmem:[#allocation2 + $0x40] sm:$0xf] %vm167_vm1, %v1299_v0  ;;  %177 = vst.msk [vmem:[#allocation2 + $0x58] sm:$0xf] %vm167_vm1, %v1299_v0  ;;  %184 = vrot.lane.b32.xlu0 %v179_v3, %s1300_s15  ;;  %198 = vrot.lane.b32.xlu1 %v1028_v4, %s1300_s15  ;;  %s1066_s13 = sld [smem:[#allocation4 + $0x181]]  ;;  %s1043_s14 = sld [smem:[#allocation4 + $0x82]] }
  0x58   : > { %s1055_s19 = sld [smem:[#allocation4 + $0x102]]  ;;  %s1044_s21 = sld [smem:[#allocation4 + $0x83]]  ;;  %vm375_vm5 = vcmask 1044480   ;;  %vm393_vm6 = vcmask 1043456   ;;  %vm403_vm7 = vcmask 130048  }
  0x59   : > { %v245_v13 = vstv %s1033_s24  ;;  %v266_v24 = vstv %s1034_s26  ;;  %s1067_s20 = sld [smem:[#allocation4 + $0x182]]  ;;  %s1056_s22 = sld [smem:[#allocation4 + $0x103]] }
  0x5a   : > { %v1506_v27 = vstv %s1035_s27  ;;  %s1068_s29 = sld [smem:[#allocation4 + $0x183]]  ;;  %s1036_s30 = sld [smem:[#allocation4 + $0x4]] }
  0x5b   : > { %212 = vrot.lane.b32.xlu1 %v1030_v5, %s1300_s15  ;;  %210 = vrot.lane.b32.xlu0 %v1029_v6, %s1300_s15  ;;  %v418_v29 = vstv %s1042_s4  ;;  %s1057_s24 = sld [smem:[#allocation4 + $0x104]]  ;;  %s1304_s26 = smov 124  }
  0x5c   : > { %v587_v38 = vstv %s1054_s10  ;;  %s1069_s27 = sld [smem:[#allocation4 + $0x184]]  ;;  %s1053_s4 = sld [smem:[#allocation4 + $0x100]] }
  0x5d   : > { %v756_v45 = vstv %s1066_s13  ;;  %v439_v52 = vstv %s1043_s14  ;;  %s1041_s10 = sld [smem:[#allocation4 + $0x80]]  ;;  %s1668_s13 = sld [smem:[#allocation5 + $0x1]] }
  0x5e   : > { %v608_v55 = vstv %s1055_s19  ;;  %v460_v1 = vstv %s1044_s21  ;;  %s1670_s14 = sld [smem:[#allocation5 + $0x2]]  ;;  %s1672_s19 = sld [smem:[#allocation5 + $0x3]] }
  0x5f   : > { %224 = vrot.lane.b32.xlu0 %v1031_v7, %s1300_s15  ;;  %226 = vrot.lane.b32.xlu1 %v1032_v8, %s1300_s15  ;;  %v777_v60 = vstv %s1067_s20  ;;  %v629_v4 = vstv %s1056_s22  ;;  %s1045_s15 = sld [smem:[#allocation4 + $0x84]]  ;;  %s1676_s21 = sld [smem:[#allocation5 + $0x80]] }
  0x60   : > { %s1674_s20 = sld [smem:[#allocation5 + $0x4]]  ;;  %s1678_s22 = sld [smem:[#allocation5 + $0x81]] }
  0x61   : > { %s1071_s25 = sld [smem:[#allocation5 + $0x181]]  ;;  %s1072_s2 = sld [smem:[#allocation5 + $0x182]] }
  0x62   : > { %s1690_s11 = sld [smem:[#allocation5 + $0x183]]  ;;  %s1692_s8 = sld [smem:[#allocation5 + $0x184]] }
  0x63   : > { %p1975_p1 = scmp.ne.s32.totalorder %s1969_s16, 0 }
  0xc5   : > { %v183_v9 = vpop.permute.xlu0 %182  ;;  %v197_v10 = vpop.permute.xlu1 %196 }
  0xc6   : > { %189 = vst.msk [vmem:[#allocation2 + $0x2] sm:$0xff] %vm188_vm2, %v183_v9  ;;  %203 = vst.msk [vmem:[#allocation2 + $0x1a] sm:$0xff] %vm188_vm2, %v197_v10  ;;  %v798_v9 = vstv %s1068_s29  ;;  %s1680_s29 = sld [smem:[#allocation5 + $0x82]] }
  0xc9   : > { %v185_v11 = vpop.permute.xlu0 %184  ;;  %v199_v12 = vpop.permute.xlu1 %198 }
  0xca   : > { %190 = vst.msk [vmem:[#allocation2 + $0xa] sm:$0xff] %vm188_vm2, %v185_v11  ;;  %204 = vst.msk [vmem:[#allocation2 + $0x22] sm:$0xff] %vm188_vm2, %v199_v12  ;;  %v308_v12 = vstv %s1036_s30  ;;  %s1049_s30 = sld [smem:[#allocation5 + $0x83]] }
  0xcd   : > { %v1488_v14 = vld [vmem:[#allocation2] sm:$0xff]  ;;  %v213_v15 = vpop.permute.xlu1 %212  ;;  %v211_v16 = vpop.permute.xlu0 %210  ;;  %v1510_v28 = vld [vmem:[#allocation2 + $0x18] sm:$0xff] }
  0xce   : > { %v246_v17 = vmul.f32 %v245_v13, %v1488_v14  ;;  %218 = vst.msk [vmem:[#allocation2 + $0x3a] sm:$0xff] %vm188_vm2, %v213_v15  ;;  %217 = vst.msk [vmem:[#allocation2 + $0x32] sm:$0xff] %vm188_vm2, %v211_v16  ;;  %v267_v25 = vmul.f32 %v266_v24, %v1488_v14  ;;  %v288_v31 = vmul.f32 %v1506_v27, %v1488_v14 }
  0xcf   : > { %v419_v32 = vmul.f32 %v418_v29, %v1510_v28  ;;  %v440_v53 = vmul.f32 %v439_v52, %v1510_v28  ;;  %v461_v2 = vmul.f32 %v460_v1, %v1510_v28  ;;  %v309_v15 = vmul.f32 %v308_v12, %v1488_v14 }
  0xd0   : > { %252 = vrot.lane.b32.xlu0 %v246_v17, %s1301_s28 }
  0xd1   : > { %v1494_v18 = vld [vmem:[#allocation2 + $0x8] sm:$0xff]  ;;  %v1496_v19 = vld [vmem:[#allocation2 + $0x10] sm:$0xf]  ;;  %v225_v20 = vpop.permute.xlu0 %224  ;;  %v227_v21 = vpop.permute.xlu1 %226  ;;  %v1522_v35 = vld [vmem:[#allocation2 + $0x20] sm:$0xff] }
  0xd2   : > { %v247_v22 = vmul.f32 %v245_v13, %v1494_v18  ;;  %v248_v23 = vmul.f32 %v245_v13, %v1496_v19  ;;  %231 = vst.msk [vmem:[#allocation2 + $0x4a] sm:$0xff] %vm188_vm2, %v225_v20  ;;  %232 = vst.msk [vmem:[#allocation2 + $0x52] sm:$0xff] %vm188_vm2, %v227_v21  ;;  %v268_v26 = vmul.f32 %v266_v24, %v1494_v18  ;;  %v1518_v33 = vld [vmem:[#allocation2 + $0x28] sm:$0xf]  ;;  %v481_v20 = vstv %s1045_s15  ;;  %s1050_s15 = sld [smem:[#allocation5 + $0x84]] }
  0xd3   : > { %v269_v30 = vmul.f32 %v266_v24, %v1496_v19  ;;  %v289_v34 = vmul.f32 %v1506_v27, %v1494_v18  ;;  %v421_v36 = vmul.f32 %v418_v29, %v1518_v33  ;;  %v420_v40 = vmul.f32 %v418_v29, %v1522_v35 }
  0xd4   : > { %254 = vrot.lane.b32.xlu1 %v247_v22, %s1301_s28  ;;  %256 = vrot.lane.b32.xlu0 %v248_v23, %s1301_s28  ;;  %v441_v54 = vmul.f32 %v439_v52, %v1522_v35  ;;  %v442_v56 = vmul.f32 %v439_v52, %v1518_v33  ;;  %v290_v0 = vmul.f32 %v1506_v27, %v1496_v19  ;;  %v650_v23 = vstv %s1057_s24  ;;  %s1686_s24 = sld [smem:[#allocation5 + $0x100]] }
  0xd5   : > { %v1527_v37 = vld [vmem:[#allocation2 + $0x30] sm:$0xff]  ;;  %v1529_v39 = vld [vmem:[#allocation2 + $0x38] sm:$0xff]  ;;  %v1536_v43 = vld [vmem:[#allocation2 + $0x40] sm:$0xf]  ;;  %v462_v3 = vmul.f32 %v460_v1, %v1522_v35  ;;  %v463_v5 = vmul.f32 %v460_v1, %v1518_v33  ;;  %v310_v16 = vmul.f32 %v308_v12, %v1494_v18  ;;  %v311_v17 = vmul.f32 %v308_v12, %v1496_v19 }
  0xd6   : > { %v588_v41 = vmul.f32 %v587_v38, %v1527_v37  ;;  %v589_v42 = vmul.f32 %v587_v38, %v1529_v39  ;;  %v590_v46 = vmul.f32 %v587_v38, %v1536_v43  ;;  %v609_v57 = vmul.f32 %v608_v55, %v1527_v37 }
  0xd7   : > { %v610_v58 = vmul.f32 %v608_v55, %v1529_v39  ;;  %v611_v59 = vmul.f32 %v608_v55, %v1536_v43  ;;  %v630_v6 = vmul.f32 %v629_v4, %v1527_v37  ;;  %v631_v7 = vmul.f32 %v629_v4, %v1529_v39 }
  0xd8   : > { %273 = vrot.lane.b32.xlu1 %v267_v25, %s1302_s1  ;;  %275 = vrot.lane.b32.xlu0 %v268_v26, %s1302_s1  ;;  %v632_v8 = vmul.f32 %v629_v4, %v1536_v43  ;;  %v482_v21 = vmul.f32 %v481_v20, %v1510_v28  ;;  %v483_v22 = vmul.f32 %v481_v20, %v1522_v35  ;;  %v819_v29 = vstv %s1069_s27  ;;  %s1060_s27 = sld [smem:[#allocation5 + $0x102]] }
  0xd9   : > { %v1538_v44 = vld [vmem:[#allocation2 + $0x48] sm:$0xff]  ;;  %v1544_v48 = vld [vmem:[#allocation2 + $0x50] sm:$0xff]  ;;  %v1546_v49 = vld [vmem:[#allocation2 + $0x58] sm:$0xf]  ;;  %v484_v24 = vmul.f32 %v481_v20, %v1518_v33  ;;  %v651_v25 = vmul.f32 %v650_v23, %v1527_v37  ;;  %v652_v26 = vmul.f32 %v650_v23, %v1529_v39  ;;  %v653_v27 = vmul.f32 %v650_v23, %v1536_v43 }
  0xda   : > { %v757_v47 = vmul.f32 %v756_v45, %v1538_v44  ;;  %v758_v50 = vmul.f32 %v756_v45, %v1544_v48  ;;  %v759_v51 = vmul.f32 %v756_v45, %v1546_v49  ;;  %v778_v61 = vmul.f32 %v777_v60, %v1538_v44 }
  0xdb   : > { %v779_v62 = vmul.f32 %v777_v60, %v1544_v48  ;;  %v780_v63 = vmul.f32 %v777_v60, %v1546_v49  ;;  %v799_v10 = vmul.f32 %v798_v9, %v1538_v44  ;;  %v800_v11 = vmul.f32 %v798_v9, %v1544_v48 }
  0xdc   : > { %277 = vrot.lane.b32.xlu1 %v269_v30, %s1302_s1  ;;  %294 = vrot.lane.b32.xlu0 %v288_v31, %s1303_s12  ;;  %v801_v13 = vmul.f32 %v798_v9, %v1546_v49  ;;  %v820_v30 = vmul.f32 %v819_v29, %v1538_v44  ;;  %v821_v31 = vmul.f32 %v819_v29, %v1544_v48 }
  0xe0   : > { %296 = vrot.lane.b32.xlu1 %v289_v34, %s1303_s12  ;;  %425 = vrot.lane.b32.xlu0 %v419_v32, %s1301_s28  ;;  %v822_v32 = vmul.f32 %v819_v29, %v1546_v49 }
  0xe4   : > { %427 = vrot.lane.b32.xlu1 %v420_v40, %s1301_s28  ;;  %429 = vrot.lane.b32.xlu0 %v421_v36, %s1301_s28 }
  0xe8   : > { %594 = vrot.lane.b32.xlu1 %v588_v41, %s1301_s28  ;;  %596 = vrot.lane.b32.xlu0 %v589_v42, %s1301_s28 }
  0xec   : > { %598 = vrot.lane.b32.xlu1 %v590_v46, %s1301_s28  ;;  %763 = vrot.lane.b32.xlu0 %v757_v47, %s1301_s28 }
  0xf0   : > { %765 = vrot.lane.b32.xlu1 %v758_v50, %s1301_s28  ;;  %767 = vrot.lane.b32.xlu0 %v759_v51, %s1301_s28  ;;  %s238_s28 = sld [smem:[#allocation4]] }
  0xf4   : > { %446 = vrot.lane.b32.xlu1 %v440_v53, %s1302_s1  ;;  %448 = vrot.lane.b32.xlu0 %v441_v54, %s1302_s1 }
  0xf6   : > { %v239_v34 = vstv %s238_s28  ;;  %s1061_s28 = sld [smem:[#allocation5 + $0x103]] }
  0xf7   : > { %v240_v36 = vmul.f32 %v239_v34, %v1488_v14  ;;  %v241_v41 = vmul.f32 %v239_v34, %v1494_v18  ;;  %v242_v42 = vmul.f32 %v239_v34, %v1496_v19  ;;  %v1702_v34 = vstv %s1670_s14 }
  0xf8   : > { %450 = vrot.lane.b32.xlu1 %v442_v56, %s1302_s1  ;;  %615 = vrot.lane.b32.xlu0 %v609_v57, %s1302_s1  ;;  %v581_v57 = vstv %s1053_s4  ;;  %s1062_s4 = sld [smem:[#allocation5 + $0x104]] }
  0xf9   : > { %v584_v1 = vmul.f32 %v581_v57, %v1536_v43 }
  0xfc   : > { %617 = vrot.lane.b32.xlu1 %v610_v58, %s1302_s1  ;;  %619 = vrot.lane.b32.xlu0 %v611_v59, %s1302_s1  ;;  %v582_v58 = vmul.f32 %v581_v57, %v1527_v37  ;;  %v583_v59 = vmul.f32 %v581_v57, %v1529_v39 }
 0x100   : > { %784 = vrot.lane.b32.xlu1 %v778_v61, %s1302_s1  ;;  %786 = vrot.lane.b32.xlu0 %v779_v62, %s1302_s1 }
 0x104   : > { %788 = vrot.lane.b32.xlu1 %v780_v63, %s1302_s1  ;;  %298 = vrot.lane.b32.xlu0 %v290_v0, %s1303_s12  ;;  %s1065_s1 = sld [smem:[#allocation4 + $0x180]] }
 0x108   : > { %467 = vrot.lane.b32.xlu1 %v461_v2, %s1303_s12  ;;  %469 = vrot.lane.b32.xlu0 %v462_v3, %s1303_s12 }
 0x10a   : > { %v750_v62 = vstv %s1065_s1  ;;  %s1688_s1 = sld [smem:[#allocation5 + $0x180]] }
 0x10b   : > { %v751_v2 = vmul.f32 %v750_v62, %v1538_v44  ;;  %v752_v37 = vmul.f32 %v750_v62, %v1544_v48  ;;  %v753_v39 = vmul.f32 %v750_v62, %v1546_v49  ;;  %v1733_v62 = vstv %s1072_s2  ;;  %s1974_s2 = sshll.u32 %s1464_s23, 6 }
 0x10c   : > { %471 = vrot.lane.b32.xlu1 %v463_v5, %s1303_s12  ;;  %636 = vrot.lane.b32.xlu0 %v630_v6, %s1303_s12 }
 0x110   : > { %638 = vrot.lane.b32.xlu1 %v631_v7, %s1303_s12  ;;  %640 = vrot.lane.b32.xlu0 %v632_v8, %s1303_s12 }
 0x114   : > { %805 = vrot.lane.b32.xlu1 %v799_v10, %s1303_s12  ;;  %807 = vrot.lane.b32.xlu0 %v800_v11, %s1303_s12 }
 0x118   : > { %809 = vrot.lane.b32.xlu1 %v801_v13, %s1303_s12  ;;  %315 = vrot.lane.b32.xlu0 %v309_v15, %s1304_s26  ;;  %s1666_s12 = sld [smem:[#allocation5]] }
 0x11c   : > { %317 = vrot.lane.b32.xlu1 %v310_v16, %s1304_s26  ;;  %319 = vrot.lane.b32.xlu0 %v311_v17, %s1304_s26 }
 0x120   : > { %488 = vrot.lane.b32.xlu1 %v482_v21, %s1304_s26  ;;  %490 = vrot.lane.b32.xlu0 %v483_v22, %s1304_s26  ;;  %v412_v22 = vstv %s1041_s10 }
 0x124   : > { %492 = vrot.lane.b32.xlu1 %v484_v24, %s1304_s26  ;;  %657 = vrot.lane.b32.xlu0 %v651_v25, %s1304_s26  ;;  %v413_v25 = vmul.f32 %v412_v22, %v1510_v28  ;;  %v1715_v28 = vstv %s1680_s29 }
 0x128   : > { %659 = vrot.lane.b32.xlu1 %v652_v26, %s1304_s26  ;;  %661 = vrot.lane.b32.xlu0 %v653_v27, %s1304_s26  ;;  %v414_v26 = vmul.f32 %v412_v22, %v1522_v35  ;;  %v415_v27 = vmul.f32 %v412_v22, %v1518_v33  ;;  %v1717_v35 = vstv %s1049_s30  ;;  %v1719_v33 = vstv %s1050_s15 }
 0x12c   : > { %826 = vrot.lane.b32.xlu1 %v820_v30, %s1304_s26  ;;  %828 = vrot.lane.b32.xlu0 %v821_v31, %s1304_s26  ;;  %v328_v31 = vstv %s1666_s12 }
 0x130   : > { %830 = vrot.lane.b32.xlu1 %v822_v32, %s1304_s26  ;;  %s1059_s26 = sld [smem:[#allocation5 + $0x101]]  ;;  %v1699_v32 = vstv %s1668_s13 }
 0x142   : > { %v253_v38 = vpop.permute.xlu0 %252 }
 0x143   : > { %v261_v40 = vadd.f32 %v253_v38, %v240_v36  ;;  %v1705_v36 = vstv %s1672_s19  ;;  %v1708_v38 = vstv %s1674_s20  ;;  %s1305_s19 = smov [#allocation9]  }
 0x144   : > { %s1212_s20 = sshll.u32 %s1305_s19, 4  ;;  %s1213_s20 = int_to_ptr.vmem [resolvable:$false] %s1212_s20 }
 0x146   : > { %v255_v45 = vpop.permute.xlu1 %254  ;;  %v257_v46 = vpop.permute.xlu0 %256 }
 0x147   : > { %v1608_v47 = vadd.f32 %v255_v45, %v241_v41  ;;  %v1610_v50 = vadd.f32 %v257_v46, %v242_v42  ;;  %v1712_v41 = vstv %s1678_s22  ;;  %v670_v42 = vstv %s1686_s24 }
 0x148   : > { %v1722_v45 = vstv %s1059_s26  ;;  %v1724_v46 = vstv %s1060_s27 }
 0x14a   : > { %v274_v51 = vpop.permute.xlu1 %273  ;;  %v1612_v52 = vpop.permute.xlu0 %275 }
 0x14b   : > { %v1614_v53 = vadd.f32 %v274_v51, %v261_v40  ;;  %v501_v40 = vstv %s1676_s21  ;;  %v1726_v51 = vstv %s1061_s28  ;;  %s1214_s21 = scalar_lea.vmem %s1213_s20, 2048 }
 0x14e   : > { %v1616_v54 = vpop.permute.xlu1 %277  ;;  %v1618_v14 = vpop.permute.xlu0 %294 }
 0x152   : > { %v1620_v55 = vpop.permute.xlu1 %296  ;;  %v1622_v18 = vpop.permute.xlu0 %425 }
 0x156   : > { %v1624_v19 = vpop.permute.xlu1 %427  ;;  %v1626_v56 = vpop.permute.xlu0 %429 }
 0x15a   : > { %v595_v60 = vpop.permute.xlu1 %594  ;;  %v597_v61 = vpop.permute.xlu0 %596 }
 0x15b   : > { %v1630_v63 = vadd.f32 %v595_v60, %v582_v58  ;;  %v1632_v0 = vadd.f32 %v597_v61, %v583_v59  ;;  %v1728_v59 = vstv %s1062_s4  ;;  %v839_v60 = vstv %s1688_s1 }
 0x15c   : > { %v1731_v61 = vstv %s1071_s25 }
 0x15e   : > { %v599_v3 = vpop.permute.xlu1 %598  ;;  %v764_v4 = vpop.permute.xlu0 %763 }
 0x15f   : > { %v1636_v5 = vadd.f32 %v599_v3, %v584_v1  ;;  %v1638_v6 = vadd.f32 %v764_v4, %v751_v2  ;;  %v283_v1 = vadd.f32 %v1612_v52, %v1608_v47  ;;  %v434_v2 = vadd.f32 %v1622_v18, %v413_v25 }
 0x160   : > { %v435_v3 = vadd.f32 %v1624_v19, %v414_v26  ;;  %v436_v4 = vadd.f32 %v1626_v56, %v415_v27 }
 0x161   : > { %v304_v22 = vadd.f32 %v1620_v55, %v283_v1 }
 0x162   : > { %v766_v7 = vpop.permute.xlu1 %765  ;;  %v768_v8 = vpop.permute.xlu0 %767 }
 0x163   : > { %v1642_v9 = vadd.f32 %v766_v7, %v752_v37  ;;  %v1644_v10 = vadd.f32 %v768_v8, %v753_v39  ;;  %v284_v37 = vadd.f32 %v1616_v54, %v1610_v50  ;;  %v303_v39 = vadd.f32 %v1618_v14, %v1614_v53 }
 0x164   : > { %v1745_v7 = vstv %s1690_s11  ;;  %v1748_v8 = vstv %s1692_s8  ;;  %s1816_s8 = scalar_lea.vmem [#allocation9], %s1974_s2  ;;  %s1083_s11 = sshll.u32 %s1284_s7, 10 }
 0x165   : > { %s930_s25 = sshll.u32 %s1816_s8, 4  ;;  %s1901_s13 = scalar_lea.hbm %s1958_s3, %s1083_s11  ;;  %s1903_s25 = int_to_ptr.vmem [resolvable:$true] %s930_s25 }
 0x166   : > { %v1646_v11 = vpop.permute.xlu1 %446  ;;  %v1648_v43 = vpop.permute.xlu0 %448  ;;  %s914_s7 = scalar_lea.sflag [#allocation8], %s1464_s23  ;;  %s1208_s14 = scalar_lea.vmem %s1903_s25, 1024 }
 0x167   : > { %v455_v47 = vadd.f32 %v1646_v11, %v434_v2  ;;  %v456_v52 = vadd.f32 %v1648_v43, %v435_v3  ;;  %p1209_p0 = scmp.ne.s32.totalorder %s1903_s25, %s1208_s14  ;;  %p1215_p12 = scmp.lt.s32.totalorder %s1903_s25, %s1213_s20 }
 0x168   : > { %p1216_p5 = scmp.lt.s32.totalorder %s1214_s21, %s1208_s14 }
 0x169   : > { %p1210_p3 = pnand %p1209_p0, %p1975_p1 }
 0x16a   : > { %v1650_v44 = vpop.permute.xlu1 %450  ;;  %v1652_v12 = vpop.permute.xlu0 %615  ;;  %p1217_p8 = por %p1216_p5, %p1215_p12 }
 0x16b   : > { %v457_v18 = vadd.f32 %v1650_v44, %v436_v4  ;;  %v624_v19 = vadd.f32 %v1652_v12, %v1630_v63  ;;  %p1211_p6 = pneg %p1210_p3 }
 0x16d   : > { %p1218_p11 = pnand %p1217_p8, %p1211_p6 }
 0x16e   : > { %v1654_v13 = vpop.permute.xlu1 %617  ;;  %v1656_v15 = vpop.permute.xlu0 %619 }
 0x16f   : > { %v625_v50 = vadd.f32 %v1654_v13, %v1632_v0  ;;  %v626_v53 = vadd.f32 %v1656_v15, %v1636_v5 }
 0x172   : > { %v1658_v48 = vpop.permute.xlu1 %784  ;;  %v1660_v49 = vpop.permute.xlu0 %786 }
 0x173   : > { %v793_v54 = vadd.f32 %v1658_v48, %v1638_v6  ;;  %v794_v56 = vadd.f32 %v1660_v49, %v1642_v9 }
 0x176   : > { %v1662_v16 = vpop.permute.xlu1 %788  ;;  %v1664_v17 = vpop.permute.xlu0 %298 }
 0x177   : > { %v795_v63 = vadd.f32 %v1662_v16, %v1644_v10  ;;  %v305_v11 = vadd.f32 %v1664_v17, %v284_v37 }
 0x17a   : > { %v1682_v20 = vpop.permute.xlu1 %467  ;;  %v1684_v21 = vpop.permute.xlu0 %469 }
 0x17b   : > { %v476_v43 = vadd.f32 %v1682_v20, %v455_v47  ;;  %v477_v5 = vadd.f32 %v1684_v21, %v456_v52 }
 0x17e   : > { %v472_v23 = vpop.permute.xlu1 %471  ;;  %v637_v24 = vpop.permute.xlu0 %636 }
 0x17f   : > { %v478_v6 = vadd.f32 %v472_v23, %v457_v18  ;;  %v645_v44 = vadd.f32 %v637_v24, %v624_v19 }
 0x182   : > { %v639_v29 = vpop.permute.xlu1 %638  ;;  %v641_v30 = vpop.permute.xlu0 %640 }
 0x183   : > { %v1769_v12 = vadd.f32 %v639_v29, %v625_v50  ;;  %v1774_v15 = vadd.f32 %v641_v30, %v626_v53 }
 0x186   : > { %v806_v57 = vpop.permute.xlu1 %805  ;;  %v808_v58 = vpop.permute.xlu0 %807 }
 0x187   : > { %v1776_v48 = vadd.f32 %v806_v57, %v793_v54  ;;  %v1778_v49 = vadd.f32 %v808_v58, %v794_v56 }
 0x18a   : > { %v810_v14 = vpop.permute.xlu1 %809  ;;  %v316_v55 = vpop.permute.xlu0 %315 }
 0x18b   : > { %v324_v0 = vadd.f32 %v316_v55, %v303_v39  ;;  %v1781_v21 = vadd.f32 %v810_v14, %v795_v63 }
 0x18d   : > { %v333_v13 = vmul.f32 %v1699_v32, %v324_v0  ;;  %v351_v9 = vmul.f32 %v1702_v34, %v324_v0  ;;  %v369_v10 = vmul.f32 %v1705_v36, %v324_v0  ;;  %v387_v20 = vmul.f32 %v1708_v38, %v324_v0 }
 0x18e   : > { %v318_v16 = vpop.permute.xlu1 %317  ;;  %v320_v17 = vpop.permute.xlu0 %319  ;;  %v329_v23 = vmul.f32 %v328_v31, %v324_v0 }
 0x18f   : > { %v325_v24 = vadd.f32 %v318_v16, %v304_v22  ;;  %v326_v25 = vadd.f32 %v320_v17, %v305_v11  ;;  %v340_v26 = vrot.slane %v333_v13, 1  ;;  %v358_v27 = vrot.slane %v351_v9, 2 }
 0x190   : > { %v376_v29 = vrot.slane %v369_v10, 3  ;;  %v394_v1 = vrot.slane %v387_v20, 4 }
 0x191   : > { %v330_v30 = vmul.f32 %v328_v31, %v325_v24  ;;  %v334_v57 = vmul.f32 %v1699_v32, %v325_v24  ;;  %v352_v58 = vmul.f32 %v1702_v34, %v325_v24  ;;  %v370_v2 = vmul.f32 %v1705_v36, %v325_v24 }
 0x192   : > { %v388_v3 = vmul.f32 %v1708_v38, %v325_v24  ;;  %v335_v4 = vmul.f32 %v1699_v32, %v326_v25  ;;  %v353_v37 = vmul.f32 %v1702_v34, %v326_v25  ;;  %v371_v39 = vmul.f32 %v1705_v36, %v326_v25  ;;  %v489_v22 = vpop.permute.xlu1 %488  ;;  %v491_v47 = vpop.permute.xlu0 %490 }
 0x193   : > { %v341_v52 = vrot.slane %v334_v57, 1  ;;  %v359_v18 = vrot.slane %v352_v58, 2  ;;  %v377_v19 = vrot.slane %v370_v2, 3  ;;  %v389_v31 = vmul.f32 %v1708_v38, %v326_v25 }
 0x194   : > { %v395_v50 = vrot.slane %v388_v3, 4  ;;  %v343_v53 = vrot.slane %v335_v4, 1  ;;  %v361_v54 = vrot.slane %v353_v37, 2  ;;  %v379_v14 = vrot.slane %v371_v39, 3 }
 0x195   : > { %v342_v55 = vsel %vm339_vm3, %v340_v26, %v341_v52  ;;  %v360_v32 = vsel %vm357_vm4, %v358_v27, %v359_v18  ;;  %v378_v34 = vsel %vm375_vm5, %v376_v29, %v377_v19  ;;  %v397_v56 = vrot.slane %v389_v31, 4 }
 0x196   : > { %v344_v36 = vsel %vm339_vm3, %v341_v52, %v343_v53  ;;  %v347_v63 = vadd.f32 %v342_v55, %v329_v23  ;;  %v362_v11 = vsel %vm357_vm4, %v359_v18, %v361_v54  ;;  %v380_v0 = vsel %vm375_vm5, %v377_v19, %v379_v14  ;;  %v493_v38 = vpop.permute.xlu1 %492  ;;  %v658_v13 = vpop.permute.xlu0 %657 }
 0x197   : > { %v348_v9 = vadd.f32 %v344_v36, %v330_v30  ;;  %v396_v10 = vsel %vm393_vm6, %v394_v1, %v395_v50  ;;  %v398_v16 = vsel %vm393_vm6, %v395_v50, %v397_v56  ;;  %v497_v17 = vadd.f32 %v489_v22, %v476_v43 }
 0x198   : > { %v365_v20 = vadd.f32 %v360_v32, %v347_v63  ;;  %v498_v24 = vadd.f32 %v491_v47, %v477_v5  ;;  %v499_v25 = vadd.f32 %v493_v38, %v478_v6  ;;  %v666_v26 = vadd.f32 %v658_v13, %v645_v44 }
 0x199   : > { %v366_v27 = vadd.f32 %v362_v11, %v348_v9  ;;  %v502_v23 = vmul.f32 %v501_v40, %v497_v17  ;;  %v506_v29 = vmul.f32 %v1712_v41, %v497_v17  ;;  %v523_v57 = vmul.f32 %v1715_v28, %v497_v17 }
 0x19a   : > { %v383_v58 = vadd.f32 %v378_v34, %v365_v20  ;;  %v503_v30 = vmul.f32 %v501_v40, %v498_v24  ;;  %v507_v1 = vmul.f32 %v1712_v41, %v498_v24  ;;  %v508_v2 = vmul.f32 %v1712_v41, %v499_v25  ;;  %v660_v56 = vpop.permute.xlu1 %659 }
 0x19b   : > { %v384_v43 = vadd.f32 %v380_v0, %v366_v27  ;;  %v512_v3 = vrot.slane %v506_v29, 1  ;;  %v524_v5 = vmul.f32 %v1715_v28, %v498_v24  ;;  %v525_v6 = vmul.f32 %v1715_v28, %v499_v25 }
 0x19c   : > { %v401_v44 = vadd.f32 %v396_v10, %v383_v58  ;;  %v513_v4 = vrot.slane %v507_v1, 1  ;;  %v515_v37 = vrot.slane %v508_v2, 1  ;;  %v529_v39 = vrot.slane %v523_v57, 2  ;;  %v662_v10 = vpop.permute.xlu0 %661 }
 0x19d   : > { %v402_v22 = vadd.f32 %v398_v16, %v384_v43  ;;  %v530_v47 = vrot.slane %v524_v5, 2  ;;  %v532_v52 = vrot.slane %v525_v6, 2  ;;  %v540_v18 = vmul.f32 %v1717_v35, %v497_v17 }
 0x19e   : > { %404 = vst.msk [vmem:[%s1816_s8] sm:$0xff] %vm403_vm7, %v401_v44  ;;  %v514_v40 = vsel %vm339_vm3, %v512_v3, %v513_v4  ;;  %v516_v41 = vsel %vm339_vm3, %v513_v4, %v515_v37  ;;  %v541_v28 = vmul.f32 %v1717_v35, %v498_v24  ;;  %v542_v19 = vmul.f32 %v1717_v35, %v499_v25  ;;  %v827_v3 = vpop.permute.xlu1 %826 }
 0x19f   : > { %405 = vst.msk [vmem:[%s1816_s8 + $0x8] sm:$0xff] %vm403_vm7, %v402_v22  ;;  %v519_v31 = vadd.f32 %v514_v40, %v502_v23  ;;  %v520_v50 = vadd.f32 %v516_v41, %v503_v30  ;;  %v531_v53 = vsel %vm357_vm4, %v529_v39, %v530_v47  ;;  %v533_v54 = vsel %vm357_vm4, %v530_v47, %v532_v52 }
 0x1a0   : > { %v546_v14 = vrot.slane %v540_v18, 3  ;;  %v547_v55 = vrot.slane %v541_v28, 3  ;;  %v549_v32 = vrot.slane %v542_v19, 3  ;;  %v557_v34 = vmul.f32 %v1719_v33, %v497_v17  ;;  %v829_v19 = vpop.permute.xlu0 %828 }
 0x1a1   : > { %v536_v36 = vadd.f32 %v531_v53, %v519_v31  ;;  %v537_v63 = vadd.f32 %v533_v54, %v520_v50  ;;  %v558_v11 = vmul.f32 %v1719_v33, %v498_v24  ;;  %v559_v35 = vmul.f32 %v1719_v33, %v499_v25 }
 0x1a2   : > { %v548_v0 = vsel %vm375_vm5, %v546_v14, %v547_v55  ;;  %v550_v38 = vsel %vm375_vm5, %v547_v55, %v549_v32  ;;  %v563_v13 = vrot.slane %v557_v34, 4  ;;  %v671_v9 = vmul.f32 %v670_v42, %v666_v26  ;;  %v831_v32 = vpop.permute.xlu1 %830 }
 0x1a3   : > { %v553_v16 = vadd.f32 %v548_v0, %v536_v36  ;;  %v554_v20 = vadd.f32 %v550_v38, %v537_v63  ;;  %v564_v27 = vrot.slane %v558_v11, 4  ;;  %v566_v17 = vrot.slane %v559_v35, 4 }
 0x1a4   : > { %v667_v23 = vadd.f32 %v660_v56, %v1769_v12  ;;  %v675_v29 = vmul.f32 %v1722_v45, %v666_v26  ;;  %v692_v33 = vmul.f32 %v1724_v46, %v666_v26  ;;  %v709_v24 = vmul.f32 %v1726_v51, %v666_v26 }
 0x1a5   : > { %v565_v25 = vsel %vm393_vm6, %v563_v13, %v564_v27  ;;  %v567_v57 = vsel %vm393_vm6, %v564_v27, %v566_v17  ;;  %v726_v58 = vmul.f32 %v1728_v59, %v666_v26  ;;  %v668_v30 = vadd.f32 %v662_v10, %v1774_v15 }
 0x1a6   : > { %v570_v1 = vadd.f32 %v565_v25, %v553_v16  ;;  %v571_v2 = vadd.f32 %v567_v57, %v554_v20  ;;  %v672_v12 = vmul.f32 %v670_v42, %v667_v23  ;;  %v676_v43 = vmul.f32 %v1722_v45, %v667_v23 }
 0x1a7   : > { %v681_v5 = vrot.slane %v675_v29, 1  ;;  %v693_v6 = vmul.f32 %v1724_v46, %v667_v23  ;;  %v698_v44 = vrot.slane %v692_v33, 2  ;;  %v710_v4 = vmul.f32 %v1726_v51, %v667_v23 }
 0x1a8   : > { %1051 = vst.msk [vmem:[%s1816_s8 + $0x10] sm:$0xff] %vm403_vm7, %v570_v1  ;;  %1052 = vst.msk [vmem:[%s1816_s8 + $0x18] sm:$0xff] %vm403_vm7, %v571_v2  ;;  %v682_v26 = vrot.slane %v676_v43, 1  ;;  %v715_v37 = vrot.slane %v709_v24, 3  ;;  %v727_v15 = vmul.f32 %v1728_v59, %v667_v23  ;;  %v732_v39 = vrot.slane %v726_v58, 4 }
 0x1a9   : > { %v699_v22 = vrot.slane %v693_v6, 2  ;;  %v716_v42 = vrot.slane %v710_v4, 3  ;;  %v677_v47 = vmul.f32 %v1722_v45, %v668_v30  ;;  %v694_v52 = vmul.f32 %v1724_v46, %v668_v30 }
 0x1aa   : > { %v683_v18 = vsel %vm339_vm3, %v681_v5, %v682_v26  ;;  %v733_v40 = vrot.slane %v727_v15, 4  ;;  %v711_v41 = vmul.f32 %v1726_v51, %v668_v30  ;;  %v728_v28 = vmul.f32 %v1728_v59, %v668_v30 }
 0x1ab   : > { %v688_v31 = vadd.f32 %v683_v18, %v671_v9  ;;  %v700_v50 = vsel %vm357_vm4, %v698_v44, %v699_v22  ;;  %v717_v53 = vsel %vm375_vm5, %v715_v37, %v716_v42  ;;  %v684_v54 = vrot.slane %v677_v47, 1 }
 0x1ac   : > { %v734_v45 = vsel %vm393_vm6, %v732_v39, %v733_v40  ;;  %v701_v14 = vrot.slane %v694_v52, 2  ;;  %v718_v46 = vrot.slane %v711_v41, 3  ;;  %v735_v55 = vrot.slane %v728_v28, 4 }
 0x1ad   : > { %v705_v34 = vadd.f32 %v700_v50, %v688_v31  ;;  %v685_v51 = vsel %vm339_vm3, %v682_v26, %v684_v54  ;;  %v835_v59 = vadd.f32 %v827_v3, %v1776_v48  ;;  %v836_v56 = vadd.f32 %v829_v19, %v1778_v49 }
 0x1ae   : > { %v689_v36 = vadd.f32 %v685_v51, %v672_v12  ;;  %v702_v63 = vsel %vm357_vm4, %v699_v22, %v701_v14  ;;  %v719_v11 = vsel %vm375_vm5, %v716_v42, %v718_v46  ;;  %v736_v35 = vsel %vm393_vm6, %v733_v40, %v735_v55 }
 0x1af   : > { %v722_v0 = vadd.f32 %v717_v53, %v705_v34  ;;  %v840_v38 = vmul.f32 %v839_v60, %v835_v59  ;;  %v841_v13 = vmul.f32 %v839_v60, %v836_v56  ;;  %v837_v9 = vadd.f32 %v831_v32, %v1781_v21 }
 0x1b0   : > { %v706_v10 = vadd.f32 %v702_v63, %v689_v36  ;;  %v844_v48 = vmul.f32 %v1731_v61, %v835_v59  ;;  %v845_v49 = vmul.f32 %v1731_v61, %v836_v56  ;;  %v861_v16 = vmul.f32 %v1733_v62, %v835_v59 }
 0x1b1   : > { %v739_v20 = vadd.f32 %v734_v45, %v722_v0  ;;  %v846_v27 = vmul.f32 %v1731_v61, %v837_v9  ;;  %v862_v17 = vmul.f32 %v1733_v62, %v836_v56  ;;  %v863_v23 = vmul.f32 %v1733_v62, %v837_v9 }
 0x1b2   : > { %v723_v29 = vadd.f32 %v719_v11, %v706_v10  ;;  %v850_v33 = vrot.slane %v844_v48, 1  ;;  %v851_v60 = vrot.slane %v845_v49, 1  ;;  %v867_v24 = vrot.slane %v861_v16, 2 }
 0x1b3   : > { %1063 = vst.msk [vmem:[%s1816_s8 + $0x20] sm:$0xff] %vm403_vm7, %v739_v20  ;;  %v853_v21 = vrot.slane %v846_v27, 1  ;;  %v868_v25 = vrot.slane %v862_v17, 2  ;;  %v870_v57 = vrot.slane %v863_v23, 2  ;;  %v878_v58 = vmul.f32 %v1745_v7, %v835_v59 }
 0x1b4   : > { %v740_v30 = vadd.f32 %v736_v35, %v723_v29  ;;  %v852_v1 = vsel %vm339_vm3, %v850_v33, %v851_v60  ;;  %v879_v61 = vmul.f32 %v1745_v7, %v836_v56  ;;  %v880_v2 = vmul.f32 %v1745_v7, %v837_v9 }
 0x1b5   : > { %v854_v62 = vsel %vm339_vm3, %v851_v60, %v853_v21  ;;  %v857_v12 = vadd.f32 %v852_v1, %v840_v38  ;;  %v869_v43 = vsel %vm357_vm4, %v867_v24, %v868_v25  ;;  %v871_v3 = vsel %vm357_vm4, %v868_v25, %v870_v57 }
 0x1b6   : > { %1064 = vst.msk [vmem:[%s1816_s8 + $0x28] sm:$0xff] %vm403_vm7, %v740_v30  ;;  %v858_v5 = vadd.f32 %v854_v62, %v841_v13  ;;  %v884_v6 = vrot.slane %v878_v58, 3  ;;  %v885_v44 = vrot.slane %v879_v61, 3  ;;  %v887_v4 = vrot.slane %v880_v2, 3 }
 0x1b7   : > { %v874_v26 = vadd.f32 %v869_v43, %v857_v12  ;;  %v895_v37 = vmul.f32 %v1748_v8, %v835_v59  ;;  %v896_v7 = vmul.f32 %v1748_v8, %v836_v56  ;;  %v897_v15 = vmul.f32 %v1748_v8, %v837_v9 }
 0x1b8   : > { %v875_v39 = vadd.f32 %v871_v3, %v858_v5  ;;  %v886_v22 = vsel %vm375_vm5, %v884_v6, %v885_v44  ;;  %v888_v42 = vsel %vm375_vm5, %v885_v44, %v887_v4 }
 0x1b9   : > { %v891_v47 = vadd.f32 %v886_v22, %v874_v26  ;;  %v901_v52 = vrot.slane %v895_v37, 4  ;;  %v902_v18 = vrot.slane %v896_v7, 4  ;;  %v904_v40 = vrot.slane %v897_v15, 4 }
 0x1ba   : > { %v892_v41 = vadd.f32 %v888_v42, %v875_v39 }
 0x1bb   : > { %v903_v28 = vsel %vm393_vm6, %v901_v52, %v902_v18  ;;  %v905_v8 = vsel %vm393_vm6, %v902_v18, %v904_v40 }
 0x1bc   : > { %v908_v19 = vadd.f32 %v903_v28, %v891_v47  ;;  %v909_v31 = vadd.f32 %v905_v8, %v892_v41 }
 0x1be   : > { %1075 = vst.msk [vmem:[%s1816_s8 + $0x30] sm:$0xff] %vm403_vm7, %v908_v19  ;;  %1076 = vst.msk [vmem:[%s1816_s8 + $0x38] sm:$0xff] %vm403_vm7, %v909_v31 }
 0x1bf   : > { %1221 = shalt.err (!%p1218_p11)
}
 0x1c0   : > { %s1222_s22 = scalar_lea.hbm %s1901_s13, 1024  ;;  %s1226_s15 = scalar_lea.hbm %s1958_s3, 2048 }
 0x1c1   : > { %p1223_p10 = scmp.ne.s32.totalorder %s1901_s13, %s1222_s22  ;;  %p1227_p4 = scmp.lt.u32.totalorder %s1901_s13, %s1958_s3 }
 0x1c2   : > { %p1228_p7 = scmp.lt.u32.totalorder %s1226_s15, %s1222_s22  ;;  %p1230_p0 = scmp.lt.u32.totalorder %s1222_s22, %s1901_s13 }
 0x1c3   : > { %p1224_p13 = pnand %p1223_p10, %p1975_p1 }
 0x1c4   : > { %p1229_p9 = por %p1228_p7, %p1227_p4 }
 0x1c5   : > { %p1225_p2 = pneg %p1224_p13 }
 0x1c6   : > { %p1231_p3 = por %p1230_p0, %p1229_p9 }
 0x1c8   : > { %p1232_p6 = pnand %p1231_p3, %p1225_p2 }
 0x1ca   : > { %1235 = shalt.err (!%p1232_p6)
}
 0x1cb   : > { %s1306_s27 = smov 128   ;;  %s1307_s28 = smov 8  }
 0x1cc   : > { %1086 = dma.vmem_to_hbm [thread:$0]  (%p1975_p1), %s1903_s25, 1024, %s1901_s13, %s914_s7, %s1306_s27, %s1306_s27, %s1307_s28  }
 0x1cd PF: > { %s945_s4 = sand.u32 1, %s1272_s0   ;;  %p1976_p12 = scmp.ne.s32.totalorder %s1970_s18, 0 }
 0x1ce   : > { %p1977_p5 = scmp.ge.s32.totalorder %s1292_s9, 2  ;;  %s946_s1 = scalar_lea.sflag [#allocation8], %s945_s4 }
 0x1d0   : > { %p1093_p8 = pnand %p1977_p5, %p1976_p12 }
 0x1d2   : > { %1267 = dma.done.wait (!%p1093_p8), %s946_s1, 1024  }
 0x1d3   : > { %1269 = vsyncadd (!%p1093_p8), %s946_s1, 4294966272  ;;  %s25_s9 = sadd.s32 1, %s1292_s9   ;;  %s1978_s7 = sld [smem:[#allocation13_spill]] }
 0x1d4   : > { %p22_p11 = scmp.ge.s32.totalorder %s25_s9, 4   ;;  %s1979_s8 = sld [smem:[#allocation14_spill]] }
 0x1d5   : > { %s1980_s0 = smov %s1276_s5  ;;  %s1981_s5 = smov %s1280_s6 }
 0x1d6   : > { %s1982_s6 = smov %s1408_s17  ;;  %24 = sbr.rel (!%p22_p11) target bundleno = 25 (0x19), region = 78 }
 0x1dd   :  { %951 = vsyncpa [#allocation7], 1 }
 0x1de   :  { %953 = vsyncpa [#allocation7 + $0x1], 1 }
 0x1df   :  { %954 = vsyncpa [#allocation8], 1 }
 0x1e0   :  { %956 = vsyncpa [#allocation8 + $0x1], 1 }

</bundles_post_ra>
